<compile_context>
chip_gen: v7x
topology: tpu7x:2x2x1
jax: 0.10.0
libtpu: 0.0.40
codegen_flags: <defaults>
</compile_context>

<pallas_src>
import jax
import jax.numpy as jnp
from jax.experimental import pallas as pl
from jax.experimental.pallas import tpu as pltpu


# ----------------------------------------------------------------------------
# Packed-parameter layout: one flat f32 vector living in SMEM.
# ----------------------------------------------------------------------------
_PARAM_LAYOUT = (
    ("stem_w", 9), ("stem_b", 3),
    ("b1_w1", 9), ("b1_b1", 3), ("b1_w2", 9), ("b1_b2", 3),
    ("b2_w1", 9), ("b2_b1", 3), ("b2_w2", 9), ("b2_b2", 3),
    ("fc_w", 12), ("fc_b", 4),
)
_OFF = {}
_o = 0
for _name, _size in _PARAM_LAYOUT:
    _OFF[_name] = _o
    _o += _size
N_PARAMS = _o  # 76


# ----------------------------------------------------------------------------
# The fused kernel.
#   params_ref : SMEM (N_PARAMS,) f32   -- all folded weights/biases
#   x_ref      : VMEM (N, 3, H, W) f32  -- input in PyTorch NCHW layout
#   o_ref      : VMEM (N, 4)      f32   -- final logits
# ----------------------------------------------------------------------------
def _toy_model_kernel(params_ref, x_ref, o_ref):
    n, c, h, w = x_ref.shape
    ho = (h + 2 - 3) // 2 + 1
    wo = (w + 2 - 3) // 2 + 1

    def p(name, idx=0):
        # Scalar read from the SMEM parameter slab (static offset).
        return params_ref[_OFF[name] + idx]

    def conv1x1(slabs, wname, bname):
        # 1x1 conv + folded BN over per-channel slabs, as VPU scalar FMAs.
        out = []
        for co in range(c):
            acc = p(wname, c * co + 0) * slabs[0]
            for ci in range(1, c):
                acc = acc + p(wname, c * co + ci) * slabs[ci]
            out.append(acc + p(bname, co))
        return out

    x = x_ref[...]                                    # (n, 3, h, w)
    xs = [x[:, ci, :, :] for ci in range(c)]          # 3 x (n, h, w)

    # ---- stem: Conv2d(3,3,1) + BN (folded) + ReLU -------------------------
    ys = [jnp.maximum(t, 0.0) for t in conv1x1(xs, "stem_w", "stem_b")]

    # ---- MaxPool2d(kernel_size=3, stride=2, padding=1) --------------------
    # Window bounds are clamped to the valid range, which is exactly PyTorch's
    # -inf-padding semantics (padded taps never win the max).  Column pass
    # keeps W on lanes; the row pass flattens (ho, wo) onto the lane axis so
    # all later stages run on lane-dense (n, ho*wo) slabs.  The pool runs once
    # on all channels stacked along the leading axis.
    def maxpool_flat(slab):                           # (m, h, w) -> (m, ho*wo)
        cols = []
        for j in range(wo):
            lo = max(2 * j - 1, 0)
            hi = min(2 * j + 1, w - 1)
            v = slab[:, :, lo:lo + 1]
            for k in range(lo + 1, hi + 1):
                v = jnp.maximum(v, slab[:, :, k:k + 1])
            cols.append(v)                            # (m, h, 1)
        r = jnp.concatenate(cols, axis=2)             # (m, h, wo)
        rows = []
        for i in range(ho):
            lo = max(2 * i - 1, 0)
            hi = min(2 * i + 1, h - 1)
            v = r[:, lo, :]
            for k in range(lo + 1, hi + 1):
                v = jnp.maximum(v, r[:, k, :])
            rows.append(v)                            # (m, wo)
        return jnp.concatenate(rows, axis=1)          # (m, ho*wo)

    stacked = jnp.concatenate(ys, axis=0)             # (c*n, h, w)
    pooled = maxpool_flat(stacked)                    # (c*n, ho*wo)
    act = [pooled[ci * n:(ci + 1) * n, :] for ci in range(c)]   # 3 x (n, ho*wo)

    # ---- BasicBlock x2: relu6(conv-bn) -> conv-bn -> +identity -> relu6 ---
    def basic_block(inp, w1, b1, w2, b2):
        hmid = [jnp.clip(t, 0.0, 6.0) for t in conv1x1(inp, w1, b1)]
        out = conv1x1(hmid, w2, b2)
        # drop_path is Identity; residual add then final ReLU6.
        return [jnp.clip(out[ci] + inp[ci], 0.0, 6.0) for ci in range(c)]

    act = basic_block(act, "b1_w1", "b1_b1", "b1_w2", "b1_b2")
    act = basic_block(act, "b2_w1", "b2_b1", "b2_w2", "b2_b2")

    # ---- AdaptiveAvgPool2d((1,1)) + flatten + Linear(3, 4) ----------------
    inv = 1.0 / float(ho * wo)
    gap = [jnp.sum(a, axis=1, keepdims=True) * inv for a in act]   # 3 x (n, 1)
    cols = []
    for k in range(4):
        v = p("fc_w", c * k + 0) * gap[0]
        for ci in range(1, c):
            v = v + p("fc_w", c * k + ci) * gap[ci]
        cols.append(v + p("fc_b", k))                 # (n, 1)
    o_ref[...] = jnp.concatenate(cols, axis=1)        # (n, 4)


def toy_model_forward(x_nchw, packed_params):
    n = x_nchw.shape[0]
    return pl.pallas_call(
        _toy_model_kernel,
        out_shape=jax.ShapeDtypeStruct((n, 4), jnp.float32),
        in_specs=[
            pl.BlockSpec(memory_space=pltpu.MemorySpace.SMEM),   # param slab
            pl.BlockSpec(memory_space=pltpu.MemorySpace.VMEM),   # input NCHW
        ],
        out_specs=pl.BlockSpec(memory_space=pltpu.MemorySpace.VMEM),
    )(packed_params, x_nchw)


# ----------------------------------------------------------------------------
# Parameter construction (deterministic, in-script) and BN folding.
# ----------------------------------------------------------------------------
def fold_conv_bn(conv_w, conv_b, gamma, beta, mean, var, eps=1e-5):
    """(Cout, Cin, 1, 1) conv + inference-mode BN -> (Cout, Cin) W, (Cout,) b."""
    w = conv_w[:, :, 0, 0]                        # (Cout, Cin)
    s = gamma / jnp.sqrt(var + eps)
    w_f = w * s[:, None]
    b_f = conv_b * s + beta - mean * s
    return w_f.astype(jnp.float32), b_f.astype(jnp.float32)


def init_params(key):
    keys = iter(jax.random.split(key, 32))

    def conv(cin, cout):
        w = jax.random.normal(next(keys), (cout, cin, 1, 1), jnp.float32) * 0.3
        b = jax.random.normal(next(keys), (cout,), jnp.float32) * 0.1
        return w, b

    def bn(ch):
        gamma = 1.0 + 0.1 * jax.random.normal(next(keys), (ch,), jnp.float32)
        beta = 0.1 * jax.random.normal(next(keys), (ch,), jnp.float32)
        mean = 0.1 * jax.random.normal(next(keys), (ch,), jnp.float32)
        var = jax.random.uniform(next(keys), (ch,), jnp.float32, 0.5, 1.5)
        return gamma, beta, mean, var

    p = {}
    p["stem_w"], p["stem_b"] = fold_conv_bn(*conv(3, 3), *bn(3))
    for name in ("b1", "b2"):
        p[f"{name}_w1"], p[f"{name}_b1"] = fold_conv_bn(*conv(3, 3), *bn(3))
        p[f"{name}_w2"], p[f"{name}_b2"] = fold_conv_bn(*conv(3, 3), *bn(3))
    p["fc_w"] = jax.random.normal(next(keys), (4, 3), jnp.float32) * 0.3   # PyTorch (out,in)
    p["fc_b"] = jax.random.normal(next(keys), (4,), jnp.float32) * 0.1
    return p


def pack_params(p):
    parts = []
    for name, size in _PARAM_LAYOUT:
        flat = p[name].reshape(-1).astype(jnp.float32)
        assert flat.shape[0] == size, (name, flat.shape)
        parts.append(flat)
    return jnp.concatenate(parts)


# ----------------------------------------------------------------------------
# Pure-JAX reference (same folded params, PyTorch forward semantics).
# ----------------------------------------------------------------------------
def reference_forward(x_nchw, p):
    def conv1x1(x, w, b):
        return jnp.einsum("nchw,oc->nohw", x, w) + b[None, :, None, None]

    x = jnp.maximum(conv1x1(x_nchw, p["stem_w"], p["stem_b"]), 0.0)
    x = jax.lax.reduce_window(
        x, -jnp.inf, jax.lax.max,
        window_dimensions=(1, 1, 3, 3), window_strides=(1, 1, 2, 2),
        padding=((0, 0), (0, 0), (1, 1), (1, 1)))
    for name in ("b1", "b2"):
        h = jnp.clip(conv1x1(x, p[f"{name}_w1"], p[f"{name}_b1"]), 0.0, 6.0)
        y = conv1x1(h, p[f"{name}_w2"], p[f"{name}_b2"]) + x
        x = jnp.clip(y, 0.0, 6.0)
    g = jnp.mean(x, axis=(2, 3))                       # (N, C)
    return g @ p["fc_w"].T + p["fc_b"][None, :]


if __name__ == "__main__":
    key = jax.random.PRNGKey(0)
    pkey, xkey = jax.random.split(key)
    params = init_params(pkey)
    packed = pack_params(params)
    x = jax.random.normal(xkey, (2, 3, 16, 16), jnp.float32)   # NCHW like PyTorch

    out = jax.jit(toy_model_forward)(x, packed)
    out = jax.block_until_ready(out)
    assert out.shape == (2, 4), out.shape
    assert bool(jnp.all(jnp.isfinite(out)))

    ref = reference_forward(x, params)
    assert bool(jnp.allclose(out, ref, atol=1e-3, rtol=1e-3)), (out, ref)
    print("KERNEL_OK")
</pallas_src>

<mosaic_0001>
module attributes {stable_mosaic.version = 11 : i64} {
  func.func @_toy_model_kernel(%arg0: memref<76xf32, #tpu.memory_space<smem>>, %arg1: memref<2x3x16x16xf32, #tpu.memory_space<vmem>>, %arg2: memref<2x4xf32, #tpu.memory_space<vmem>>) attributes {dimension_semantics = [], scalar_prefetch = 0 : i64, scratch_operands = 0 : i64, tpu.core_type = #tpu.core_type<tc>} {
    %c0 = arith.constant 0 : index
    %c0_0 = arith.constant 0 : index
    %c0_1 = arith.constant 0 : index
    %c0_2 = arith.constant 0 : index
    %0 = vector.load %arg1[%c0, %c0_0, %c0_1, %c0_2] : memref<2x3x16x16xf32, #tpu.memory_space<vmem>>, vector<2x3x16x16xf32>
    %1 = vector.extract_strided_slice %0 {offsets = [0, 0, 0, 0], sizes = [2, 1, 16, 16], strides = [1, 1, 1, 1]} : vector<2x3x16x16xf32> to vector<2x1x16x16xf32>
    %2 = vector.shape_cast %1 : vector<2x1x16x16xf32> to vector<2x16x16xf32>
    %3 = vector.extract_strided_slice %0 {offsets = [0, 1, 0, 0], sizes = [2, 1, 16, 16], strides = [1, 1, 1, 1]} : vector<2x3x16x16xf32> to vector<2x1x16x16xf32>
    %4 = vector.shape_cast %3 : vector<2x1x16x16xf32> to vector<2x16x16xf32>
    %5 = vector.extract_strided_slice %0 {offsets = [0, 2, 0, 0], sizes = [2, 1, 16, 16], strides = [1, 1, 1, 1]} : vector<2x3x16x16xf32> to vector<2x1x16x16xf32>
    %6 = vector.shape_cast %5 : vector<2x1x16x16xf32> to vector<2x16x16xf32>
    %c0_3 = arith.constant 0 : index
    %7 = memref.load %arg0[%c0_3] : memref<76xf32, #tpu.memory_space<smem>>
    %8 = vector.broadcast %7 : f32 to vector<2x16x16xf32>
    %9 = arith.mulf %8, %2 : vector<2x16x16xf32>
    %c1 = arith.constant 1 : index
    %10 = memref.load %arg0[%c1] : memref<76xf32, #tpu.memory_space<smem>>
    %11 = vector.broadcast %10 : f32 to vector<2x16x16xf32>
    %12 = arith.mulf %11, %4 : vector<2x16x16xf32>
    %13 = arith.addf %9, %12 : vector<2x16x16xf32>
    %c2 = arith.constant 2 : index
    %14 = memref.load %arg0[%c2] : memref<76xf32, #tpu.memory_space<smem>>
    %15 = vector.broadcast %14 : f32 to vector<2x16x16xf32>
    %16 = arith.mulf %15, %6 : vector<2x16x16xf32>
    %17 = arith.addf %13, %16 : vector<2x16x16xf32>
    %c9 = arith.constant 9 : index
    %18 = memref.load %arg0[%c9] : memref<76xf32, #tpu.memory_space<smem>>
    %19 = vector.broadcast %18 : f32 to vector<2x16x16xf32>
    %20 = arith.addf %17, %19 : vector<2x16x16xf32>
    %c3 = arith.constant 3 : index
    %21 = memref.load %arg0[%c3] : memref<76xf32, #tpu.memory_space<smem>>
    %22 = vector.broadcast %21 : f32 to vector<2x16x16xf32>
    %23 = arith.mulf %22, %2 : vector<2x16x16xf32>
    %c4 = arith.constant 4 : index
    %24 = memref.load %arg0[%c4] : memref<76xf32, #tpu.memory_space<smem>>
    %25 = vector.broadcast %24 : f32 to vector<2x16x16xf32>
    %26 = arith.mulf %25, %4 : vector<2x16x16xf32>
    %27 = arith.addf %23, %26 : vector<2x16x16xf32>
    %c5 = arith.constant 5 : index
    %28 = memref.load %arg0[%c5] : memref<76xf32, #tpu.memory_space<smem>>
    %29 = vector.broadcast %28 : f32 to vector<2x16x16xf32>
    %30 = arith.mulf %29, %6 : vector<2x16x16xf32>
    %31 = arith.addf %27, %30 : vector<2x16x16xf32>
    %c10 = arith.constant 10 : index
    %32 = memref.load %arg0[%c10] : memref<76xf32, #tpu.memory_space<smem>>
    %33 = vector.broadcast %32 : f32 to vector<2x16x16xf32>
    %34 = arith.addf %31, %33 : vector<2x16x16xf32>
    %c6 = arith.constant 6 : index
    %35 = memref.load %arg0[%c6] : memref<76xf32, #tpu.memory_space<smem>>
    %36 = vector.broadcast %35 : f32 to vector<2x16x16xf32>
    %37 = arith.mulf %36, %2 : vector<2x16x16xf32>
    %c7 = arith.constant 7 : index
    %38 = memref.load %arg0[%c7] : memref<76xf32, #tpu.memory_space<smem>>
    %39 = vector.broadcast %38 : f32 to vector<2x16x16xf32>
    %40 = arith.mulf %39, %4 : vector<2x16x16xf32>
    %41 = arith.addf %37, %40 : vector<2x16x16xf32>
    %c8 = arith.constant 8 : index
    %42 = memref.load %arg0[%c8] : memref<76xf32, #tpu.memory_space<smem>>
    %43 = vector.broadcast %42 : f32 to vector<2x16x16xf32>
    %44 = arith.mulf %43, %6 : vector<2x16x16xf32>
    %45 = arith.addf %41, %44 : vector<2x16x16xf32>
    %c11 = arith.constant 11 : index
    %46 = memref.load %arg0[%c11] : memref<76xf32, #tpu.memory_space<smem>>
    %47 = vector.broadcast %46 : f32 to vector<2x16x16xf32>
    %48 = arith.addf %45, %47 : vector<2x16x16xf32>
    %cst = arith.constant 0.000000e+00 : f32
    %49 = vector.broadcast %cst : f32 to vector<2x16x16xf32>
    %50 = arith.maximumf %20, %49 : vector<2x16x16xf32>
    %cst_4 = arith.constant 0.000000e+00 : f32
    %51 = vector.broadcast %cst_4 : f32 to vector<2x16x16xf32>
    %52 = arith.maximumf %34, %51 : vector<2x16x16xf32>
    %cst_5 = arith.constant 0.000000e+00 : f32
    %53 = vector.broadcast %cst_5 : f32 to vector<2x16x16xf32>
    %54 = arith.maximumf %48, %53 : vector<2x16x16xf32>
    %55 = tpu.concatenate %50, %52, %54 in 0 : vector<2x16x16xf32>, vector<2x16x16xf32>, vector<2x16x16xf32> -> vector<6x16x16xf32>
    %56 = vector.extract_strided_slice %55 {offsets = [0, 0, 0], sizes = [6, 16, 1], strides = [1, 1, 1]} : vector<6x16x16xf32> to vector<6x16x1xf32>
    %57 = vector.extract_strided_slice %55 {offsets = [0, 0, 1], sizes = [6, 16, 1], strides = [1, 1, 1]} : vector<6x16x16xf32> to vector<6x16x1xf32>
    %58 = arith.maximumf %56, %57 : vector<6x16x1xf32>
    %59 = vector.extract_strided_slice %55 {offsets = [0, 0, 1], sizes = [6, 16, 1], strides = [1, 1, 1]} : vector<6x16x16xf32> to vector<6x16x1xf32>
    %60 = vector.extract_strided_slice %55 {offsets = [0, 0, 2], sizes = [6, 16, 1], strides = [1, 1, 1]} : vector<6x16x16xf32> to vector<6x16x1xf32>
    %61 = arith.maximumf %59, %60 : vector<6x16x1xf32>
    %62 = vector.extract_strided_slice %55 {offsets = [0, 0, 3], sizes = [6, 16, 1], strides = [1, 1, 1]} : vector<6x16x16xf32> to vector<6x16x1xf32>
    %63 = arith.maximumf %61, %62 : vector<6x16x1xf32>
    %64 = vector.extract_strided_slice %55 {offsets = [0, 0, 3], sizes = [6, 16, 1], strides = [1, 1, 1]} : vector<6x16x16xf32> to vector<6x16x1xf32>
    %65 = vector.extract_strided_slice %55 {offsets = [0, 0, 4], sizes = [6, 16, 1], strides = [1, 1, 1]} : vector<6x16x16xf32> to vector<6x16x1xf32>
    %66 = arith.maximumf %64, %65 : vector<6x16x1xf32>
    %67 = vector.extract_strided_slice %55 {offsets = [0, 0, 5], sizes = [6, 16, 1], strides = [1, 1, 1]} : vector<6x16x16xf32> to vector<6x16x1xf32>
    %68 = arith.maximumf %66, %67 : vector<6x16x1xf32>
    %69 = vector.extract_strided_slice %55 {offsets = [0, 0, 5], sizes = [6, 16, 1], strides = [1, 1, 1]} : vector<6x16x16xf32> to vector<6x16x1xf32>
    %70 = vector.extract_strided_slice %55 {offsets = [0, 0, 6], sizes = [6, 16, 1], strides = [1, 1, 1]} : vector<6x16x16xf32> to vector<6x16x1xf32>
    %71 = arith.maximumf %69, %70 : vector<6x16x1xf32>
    %72 = vector.extract_strided_slice %55 {offsets = [0, 0, 7], sizes = [6, 16, 1], strides = [1, 1, 1]} : vector<6x16x16xf32> to vector<6x16x1xf32>
    %73 = arith.maximumf %71, %72 : vector<6x16x1xf32>
    %74 = vector.extract_strided_slice %55 {offsets = [0, 0, 7], sizes = [6, 16, 1], strides = [1, 1, 1]} : vector<6x16x16xf32> to vector<6x16x1xf32>
    %75 = vector.extract_strided_slice %55 {offsets = [0, 0, 8], sizes = [6, 16, 1], strides = [1, 1, 1]} : vector<6x16x16xf32> to vector<6x16x1xf32>
    %76 = arith.maximumf %74, %75 : vector<6x16x1xf32>
    %77 = vector.extract_strided_slice %55 {offsets = [0, 0, 9], sizes = [6, 16, 1], strides = [1, 1, 1]} : vector<6x16x16xf32> to vector<6x16x1xf32>
    %78 = arith.maximumf %76, %77 : vector<6x16x1xf32>
    %79 = vector.extract_strided_slice %55 {offsets = [0, 0, 9], sizes = [6, 16, 1], strides = [1, 1, 1]} : vector<6x16x16xf32> to vector<6x16x1xf32>
    %80 = vector.extract_strided_slice %55 {offsets = [0, 0, 10], sizes = [6, 16, 1], strides = [1, 1, 1]} : vector<6x16x16xf32> to vector<6x16x1xf32>
    %81 = arith.maximumf %79, %80 : vector<6x16x1xf32>
    %82 = vector.extract_strided_slice %55 {offsets = [0, 0, 11], sizes = [6, 16, 1], strides = [1, 1, 1]} : vector<6x16x16xf32> to vector<6x16x1xf32>
    %83 = arith.maximumf %81, %82 : vector<6x16x1xf32>
    %84 = vector.extract_strided_slice %55 {offsets = [0, 0, 11], sizes = [6, 16, 1], strides = [1, 1, 1]} : vector<6x16x16xf32> to vector<6x16x1xf32>
    %85 = vector.extract_strided_slice %55 {offsets = [0, 0, 12], sizes = [6, 16, 1], strides = [1, 1, 1]} : vector<6x16x16xf32> to vector<6x16x1xf32>
    %86 = arith.maximumf %84, %85 : vector<6x16x1xf32>
    %87 = vector.extract_strided_slice %55 {offsets = [0, 0, 13], sizes = [6, 16, 1], strides = [1, 1, 1]} : vector<6x16x16xf32> to vector<6x16x1xf32>
    %88 = arith.maximumf %86, %87 : vector<6x16x1xf32>
    %89 = vector.extract_strided_slice %55 {offsets = [0, 0, 13], sizes = [6, 16, 1], strides = [1, 1, 1]} : vector<6x16x16xf32> to vector<6x16x1xf32>
    %90 = vector.extract_strided_slice %55 {offsets = [0, 0, 14], sizes = [6, 16, 1], strides = [1, 1, 1]} : vector<6x16x16xf32> to vector<6x16x1xf32>
    %91 = arith.maximumf %89, %90 : vector<6x16x1xf32>
    %92 = vector.extract_strided_slice %55 {offsets = [0, 0, 15], sizes = [6, 16, 1], strides = [1, 1, 1]} : vector<6x16x16xf32> to vector<6x16x1xf32>
    %93 = arith.maximumf %91, %92 : vector<6x16x1xf32>
    %94 = tpu.concatenate %58, %63, %68, %73, %78, %83, %88, %93 in 2 : vector<6x16x1xf32>, vector<6x16x1xf32>, vector<6x16x1xf32>, vector<6x16x1xf32>, vector<6x16x1xf32>, vector<6x16x1xf32>, vector<6x16x1xf32>, vector<6x16x1xf32> -> vector<6x16x8xf32>
    %95 = vector.extract_strided_slice %94 {offsets = [0, 0, 0], sizes = [6, 1, 8], strides = [1, 1, 1]} : vector<6x16x8xf32> to vector<6x1x8xf32>
    %96 = vector.shape_cast %95 : vector<6x1x8xf32> to vector<6x8xf32>
    %97 = vector.extract_strided_slice %94 {offsets = [0, 1, 0], sizes = [6, 1, 8], strides = [1, 1, 1]} : vector<6x16x8xf32> to vector<6x1x8xf32>
    %98 = vector.shape_cast %97 : vector<6x1x8xf32> to vector<6x8xf32>
    %99 = arith.maximumf %96, %98 : vector<6x8xf32>
    %100 = vector.extract_strided_slice %94 {offsets = [0, 1, 0], sizes = [6, 1, 8], strides = [1, 1, 1]} : vector<6x16x8xf32> to vector<6x1x8xf32>
    %101 = vector.shape_cast %100 : vector<6x1x8xf32> to vector<6x8xf32>
    %102 = vector.extract_strided_slice %94 {offsets = [0, 2, 0], sizes = [6, 1, 8], strides = [1, 1, 1]} : vector<6x16x8xf32> to vector<6x1x8xf32>
    %103 = vector.shape_cast %102 : vector<6x1x8xf32> to vector<6x8xf32>
    %104 = arith.maximumf %101, %103 : vector<6x8xf32>
    %105 = vector.extract_strided_slice %94 {offsets = [0, 3, 0], sizes = [6, 1, 8], strides = [1, 1, 1]} : vector<6x16x8xf32> to vector<6x1x8xf32>
    %106 = vector.shape_cast %105 : vector<6x1x8xf32> to vector<6x8xf32>
    %107 = arith.maximumf %104, %106 : vector<6x8xf32>
    %108 = vector.extract_strided_slice %94 {offsets = [0, 3, 0], sizes = [6, 1, 8], strides = [1, 1, 1]} : vector<6x16x8xf32> to vector<6x1x8xf32>
    %109 = vector.shape_cast %108 : vector<6x1x8xf32> to vector<6x8xf32>
    %110 = vector.extract_strided_slice %94 {offsets = [0, 4, 0], sizes = [6, 1, 8], strides = [1, 1, 1]} : vector<6x16x8xf32> to vector<6x1x8xf32>
    %111 = vector.shape_cast %110 : vector<6x1x8xf32> to vector<6x8xf32>
    %112 = arith.maximumf %109, %111 : vector<6x8xf32>
    %113 = vector.extract_strided_slice %94 {offsets = [0, 5, 0], sizes = [6, 1, 8], strides = [1, 1, 1]} : vector<6x16x8xf32> to vector<6x1x8xf32>
    %114 = vector.shape_cast %113 : vector<6x1x8xf32> to vector<6x8xf32>
    %115 = arith.maximumf %112, %114 : vector<6x8xf32>
    %116 = vector.extract_strided_slice %94 {offsets = [0, 5, 0], sizes = [6, 1, 8], strides = [1, 1, 1]} : vector<6x16x8xf32> to vector<6x1x8xf32>
    %117 = vector.shape_cast %116 : vector<6x1x8xf32> to vector<6x8xf32>
    %118 = vector.extract_strided_slice %94 {offsets = [0, 6, 0], sizes = [6, 1, 8], strides = [1, 1, 1]} : vector<6x16x8xf32> to vector<6x1x8xf32>
    %119 = vector.shape_cast %118 : vector<6x1x8xf32> to vector<6x8xf32>
    %120 = arith.maximumf %117, %119 : vector<6x8xf32>
    %121 = vector.extract_strided_slice %94 {offsets = [0, 7, 0], sizes = [6, 1, 8], strides = [1, 1, 1]} : vector<6x16x8xf32> to vector<6x1x8xf32>
    %122 = vector.shape_cast %121 : vector<6x1x8xf32> to vector<6x8xf32>
    %123 = arith.maximumf %120, %122 : vector<6x8xf32>
    %124 = vector.extract_strided_slice %94 {offsets = [0, 7, 0], sizes = [6, 1, 8], strides = [1, 1, 1]} : vector<6x16x8xf32> to vector<6x1x8xf32>
    %125 = vector.shape_cast %124 : vector<6x1x8xf32> to vector<6x8xf32>
    %126 = vector.extract_strided_slice %94 {offsets = [0, 8, 0], sizes = [6, 1, 8], strides = [1, 1, 1]} : vector<6x16x8xf32> to vector<6x1x8xf32>
    %127 = vector.shape_cast %126 : vector<6x1x8xf32> to vector<6x8xf32>
    %128 = arith.maximumf %125, %127 : vector<6x8xf32>
    %129 = vector.extract_strided_slice %94 {offsets = [0, 9, 0], sizes = [6, 1, 8], strides = [1, 1, 1]} : vector<6x16x8xf32> to vector<6x1x8xf32>
    %130 = vector.shape_cast %129 : vector<6x1x8xf32> to vector<6x8xf32>
    %131 = arith.maximumf %128, %130 : vector<6x8xf32>
    %132 = vector.extract_strided_slice %94 {offsets = [0, 9, 0], sizes = [6, 1, 8], strides = [1, 1, 1]} : vector<6x16x8xf32> to vector<6x1x8xf32>
    %133 = vector.shape_cast %132 : vector<6x1x8xf32> to vector<6x8xf32>
    %134 = vector.extract_strided_slice %94 {offsets = [0, 10, 0], sizes = [6, 1, 8], strides = [1, 1, 1]} : vector<6x16x8xf32> to vector<6x1x8xf32>
    %135 = vector.shape_cast %134 : vector<6x1x8xf32> to vector<6x8xf32>
    %136 = arith.maximumf %133, %135 : vector<6x8xf32>
    %137 = vector.extract_strided_slice %94 {offsets = [0, 11, 0], sizes = [6, 1, 8], strides = [1, 1, 1]} : vector<6x16x8xf32> to vector<6x1x8xf32>
    %138 = vector.shape_cast %137 : vector<6x1x8xf32> to vector<6x8xf32>
    %139 = arith.maximumf %136, %138 : vector<6x8xf32>
    %140 = vector.extract_strided_slice %94 {offsets = [0, 11, 0], sizes = [6, 1, 8], strides = [1, 1, 1]} : vector<6x16x8xf32> to vector<6x1x8xf32>
    %141 = vector.shape_cast %140 : vector<6x1x8xf32> to vector<6x8xf32>
    %142 = vector.extract_strided_slice %94 {offsets = [0, 12, 0], sizes = [6, 1, 8], strides = [1, 1, 1]} : vector<6x16x8xf32> to vector<6x1x8xf32>
    %143 = vector.shape_cast %142 : vector<6x1x8xf32> to vector<6x8xf32>
    %144 = arith.maximumf %141, %143 : vector<6x8xf32>
    %145 = vector.extract_strided_slice %94 {offsets = [0, 13, 0], sizes = [6, 1, 8], strides = [1, 1, 1]} : vector<6x16x8xf32> to vector<6x1x8xf32>
    %146 = vector.shape_cast %145 : vector<6x1x8xf32> to vector<6x8xf32>
    %147 = arith.maximumf %144, %146 : vector<6x8xf32>
    %148 = vector.extract_strided_slice %94 {offsets = [0, 13, 0], sizes = [6, 1, 8], strides = [1, 1, 1]} : vector<6x16x8xf32> to vector<6x1x8xf32>
    %149 = vector.shape_cast %148 : vector<6x1x8xf32> to vector<6x8xf32>
    %150 = vector.extract_strided_slice %94 {offsets = [0, 14, 0], sizes = [6, 1, 8], strides = [1, 1, 1]} : vector<6x16x8xf32> to vector<6x1x8xf32>
    %151 = vector.shape_cast %150 : vector<6x1x8xf32> to vector<6x8xf32>
    %152 = arith.maximumf %149, %151 : vector<6x8xf32>
    %153 = vector.extract_strided_slice %94 {offsets = [0, 15, 0], sizes = [6, 1, 8], strides = [1, 1, 1]} : vector<6x16x8xf32> to vector<6x1x8xf32>
    %154 = vector.shape_cast %153 : vector<6x1x8xf32> to vector<6x8xf32>
    %155 = arith.maximumf %152, %154 : vector<6x8xf32>
    %156 = tpu.concatenate %99, %107, %115, %123, %131, %139, %147, %155 in 1 : vector<6x8xf32>, vector<6x8xf32>, vector<6x8xf32>, vector<6x8xf32>, vector<6x8xf32>, vector<6x8xf32>, vector<6x8xf32>, vector<6x8xf32> -> vector<6x64xf32>
    %157 = vector.extract_strided_slice %156 {offsets = [0, 0], sizes = [2, 64], strides = [1, 1]} : vector<6x64xf32> to vector<2x64xf32>
    %158 = vector.extract_strided_slice %156 {offsets = [2, 0], sizes = [2, 64], strides = [1, 1]} : vector<6x64xf32> to vector<2x64xf32>
    %159 = vector.extract_strided_slice %156 {offsets = [4, 0], sizes = [2, 64], strides = [1, 1]} : vector<6x64xf32> to vector<2x64xf32>
    %c12 = arith.constant 12 : index
    %160 = memref.load %arg0[%c12] : memref<76xf32, #tpu.memory_space<smem>>
    %161 = vector.broadcast %160 : f32 to vector<2x64xf32>
    %162 = arith.mulf %161, %157 : vector<2x64xf32>
    %c13 = arith.constant 13 : index
    %163 = memref.load %arg0[%c13] : memref<76xf32, #tpu.memory_space<smem>>
    %164 = vector.broadcast %163 : f32 to vector<2x64xf32>
    %165 = arith.mulf %164, %158 : vector<2x64xf32>
    %166 = arith.addf %162, %165 : vector<2x64xf32>
    %c14 = arith.constant 14 : index
    %167 = memref.load %arg0[%c14] : memref<76xf32, #tpu.memory_space<smem>>
    %168 = vector.broadcast %167 : f32 to vector<2x64xf32>
    %169 = arith.mulf %168, %159 : vector<2x64xf32>
    %170 = arith.addf %166, %169 : vector<2x64xf32>
    %c21 = arith.constant 21 : index
    %171 = memref.load %arg0[%c21] : memref<76xf32, #tpu.memory_space<smem>>
    %172 = vector.broadcast %171 : f32 to vector<2x64xf32>
    %173 = arith.addf %170, %172 : vector<2x64xf32>
    %c15 = arith.constant 15 : index
    %174 = memref.load %arg0[%c15] : memref<76xf32, #tpu.memory_space<smem>>
    %175 = vector.broadcast %174 : f32 to vector<2x64xf32>
    %176 = arith.mulf %175, %157 : vector<2x64xf32>
    %c16 = arith.constant 16 : index
    %177 = memref.load %arg0[%c16] : memref<76xf32, #tpu.memory_space<smem>>
    %178 = vector.broadcast %177 : f32 to vector<2x64xf32>
    %179 = arith.mulf %178, %158 : vector<2x64xf32>
    %180 = arith.addf %176, %179 : vector<2x64xf32>
    %c17 = arith.constant 17 : index
    %181 = memref.load %arg0[%c17] : memref<76xf32, #tpu.memory_space<smem>>
    %182 = vector.broadcast %181 : f32 to vector<2x64xf32>
    %183 = arith.mulf %182, %159 : vector<2x64xf32>
    %184 = arith.addf %180, %183 : vector<2x64xf32>
    %c22 = arith.constant 22 : index
    %185 = memref.load %arg0[%c22] : memref<76xf32, #tpu.memory_space<smem>>
    %186 = vector.broadcast %185 : f32 to vector<2x64xf32>
    %187 = arith.addf %184, %186 : vector<2x64xf32>
    %c18 = arith.constant 18 : index
    %188 = memref.load %arg0[%c18] : memref<76xf32, #tpu.memory_space<smem>>
    %189 = vector.broadcast %188 : f32 to vector<2x64xf32>
    %190 = arith.mulf %189, %157 : vector<2x64xf32>
    %c19 = arith.constant 19 : index
    %191 = memref.load %arg0[%c19] : memref<76xf32, #tpu.memory_space<smem>>
    %192 = vector.broadcast %191 : f32 to vector<2x64xf32>
    %193 = arith.mulf %192, %158 : vector<2x64xf32>
    %194 = arith.addf %190, %193 : vector<2x64xf32>
    %c20 = arith.constant 20 : index
    %195 = memref.load %arg0[%c20] : memref<76xf32, #tpu.memory_space<smem>>
    %196 = vector.broadcast %195 : f32 to vector<2x64xf32>
    %197 = arith.mulf %196, %159 : vector<2x64xf32>
    %198 = arith.addf %194, %197 : vector<2x64xf32>
    %c23 = arith.constant 23 : index
    %199 = memref.load %arg0[%c23] : memref<76xf32, #tpu.memory_space<smem>>
    %200 = vector.broadcast %199 : f32 to vector<2x64xf32>
    %201 = arith.addf %198, %200 : vector<2x64xf32>
    %cst_6 = arith.constant 0.000000e+00 : f32
    %cst_7 = arith.constant 6.000000e+00 : f32
    %202 = vector.broadcast %cst_6 : f32 to vector<2x64xf32>
    %203 = arith.maximumf %202, %173 : vector<2x64xf32>
    %204 = vector.broadcast %cst_7 : f32 to vector<2x64xf32>
    %205 = arith.minimumf %204, %203 : vector<2x64xf32>
    %cst_8 = arith.constant 0.000000e+00 : f32
    %cst_9 = arith.constant 6.000000e+00 : f32
    %206 = vector.broadcast %cst_8 : f32 to vector<2x64xf32>
    %207 = arith.maximumf %206, %187 : vector<2x64xf32>
    %208 = vector.broadcast %cst_9 : f32 to vector<2x64xf32>
    %209 = arith.minimumf %208, %207 : vector<2x64xf32>
    %cst_10 = arith.constant 0.000000e+00 : f32
    %cst_11 = arith.constant 6.000000e+00 : f32
    %210 = vector.broadcast %cst_10 : f32 to vector<2x64xf32>
    %211 = arith.maximumf %210, %201 : vector<2x64xf32>
    %212 = vector.broadcast %cst_11 : f32 to vector<2x64xf32>
    %213 = arith.minimumf %212, %211 : vector<2x64xf32>
    %c24 = arith.constant 24 : index
    %214 = memref.load %arg0[%c24] : memref<76xf32, #tpu.memory_space<smem>>
    %215 = vector.broadcast %214 : f32 to vector<2x64xf32>
    %216 = arith.mulf %215, %205 : vector<2x64xf32>
    %c25 = arith.constant 25 : index
    %217 = memref.load %arg0[%c25] : memref<76xf32, #tpu.memory_space<smem>>
    %218 = vector.broadcast %217 : f32 to vector<2x64xf32>
    %219 = arith.mulf %218, %209 : vector<2x64xf32>
    %220 = arith.addf %216, %219 : vector<2x64xf32>
    %c26 = arith.constant 26 : index
    %221 = memref.load %arg0[%c26] : memref<76xf32, #tpu.memory_space<smem>>
    %222 = vector.broadcast %221 : f32 to vector<2x64xf32>
    %223 = arith.mulf %222, %213 : vector<2x64xf32>
    %224 = arith.addf %220, %223 : vector<2x64xf32>
    %c33 = arith.constant 33 : index
    %225 = memref.load %arg0[%c33] : memref<76xf32, #tpu.memory_space<smem>>
    %226 = vector.broadcast %225 : f32 to vector<2x64xf32>
    %227 = arith.addf %224, %226 : vector<2x64xf32>
    %c27 = arith.constant 27 : index
    %228 = memref.load %arg0[%c27] : memref<76xf32, #tpu.memory_space<smem>>
    %229 = vector.broadcast %228 : f32 to vector<2x64xf32>
    %230 = arith.mulf %229, %205 : vector<2x64xf32>
    %c28 = arith.constant 28 : index
    %231 = memref.load %arg0[%c28] : memref<76xf32, #tpu.memory_space<smem>>
    %232 = vector.broadcast %231 : f32 to vector<2x64xf32>
    %233 = arith.mulf %232, %209 : vector<2x64xf32>
    %234 = arith.addf %230, %233 : vector<2x64xf32>
    %c29 = arith.constant 29 : index
    %235 = memref.load %arg0[%c29] : memref<76xf32, #tpu.memory_space<smem>>
    %236 = vector.broadcast %235 : f32 to vector<2x64xf32>
    %237 = arith.mulf %236, %213 : vector<2x64xf32>
    %238 = arith.addf %234, %237 : vector<2x64xf32>
    %c34 = arith.constant 34 : index
    %239 = memref.load %arg0[%c34] : memref<76xf32, #tpu.memory_space<smem>>
    %240 = vector.broadcast %239 : f32 to vector<2x64xf32>
    %241 = arith.addf %238, %240 : vector<2x64xf32>
    %c30 = arith.constant 30 : index
    %242 = memref.load %arg0[%c30] : memref<76xf32, #tpu.memory_space<smem>>
    %243 = vector.broadcast %242 : f32 to vector<2x64xf32>
    %244 = arith.mulf %243, %205 : vector<2x64xf32>
    %c31 = arith.constant 31 : index
    %245 = memref.load %arg0[%c31] : memref<76xf32, #tpu.memory_space<smem>>
    %246 = vector.broadcast %245 : f32 to vector<2x64xf32>
    %247 = arith.mulf %246, %209 : vector<2x64xf32>
    %248 = arith.addf %244, %247 : vector<2x64xf32>
    %c32 = arith.constant 32 : index
    %249 = memref.load %arg0[%c32] : memref<76xf32, #tpu.memory_space<smem>>
    %250 = vector.broadcast %249 : f32 to vector<2x64xf32>
    %251 = arith.mulf %250, %213 : vector<2x64xf32>
    %252 = arith.addf %248, %251 : vector<2x64xf32>
    %c35 = arith.constant 35 : index
    %253 = memref.load %arg0[%c35] : memref<76xf32, #tpu.memory_space<smem>>
    %254 = vector.broadcast %253 : f32 to vector<2x64xf32>
    %255 = arith.addf %252, %254 : vector<2x64xf32>
    %256 = arith.addf %227, %157 : vector<2x64xf32>
    %cst_12 = arith.constant 0.000000e+00 : f32
    %cst_13 = arith.constant 6.000000e+00 : f32
    %257 = vector.broadcast %cst_12 : f32 to vector<2x64xf32>
    %258 = arith.maximumf %257, %256 : vector<2x64xf32>
    %259 = vector.broadcast %cst_13 : f32 to vector<2x64xf32>
    %260 = arith.minimumf %259, %258 : vector<2x64xf32>
    %261 = arith.addf %241, %158 : vector<2x64xf32>
    %cst_14 = arith.constant 0.000000e+00 : f32
    %cst_15 = arith.constant 6.000000e+00 : f32
    %262 = vector.broadcast %cst_14 : f32 to vector<2x64xf32>
    %263 = arith.maximumf %262, %261 : vector<2x64xf32>
    %264 = vector.broadcast %cst_15 : f32 to vector<2x64xf32>
    %265 = arith.minimumf %264, %263 : vector<2x64xf32>
    %266 = arith.addf %255, %159 : vector<2x64xf32>
    %cst_16 = arith.constant 0.000000e+00 : f32
    %cst_17 = arith.constant 6.000000e+00 : f32
    %267 = vector.broadcast %cst_16 : f32 to vector<2x64xf32>
    %268 = arith.maximumf %267, %266 : vector<2x64xf32>
    %269 = vector.broadcast %cst_17 : f32 to vector<2x64xf32>
    %270 = arith.minimumf %269, %268 : vector<2x64xf32>
    %c36 = arith.constant 36 : index
    %271 = memref.load %arg0[%c36] : memref<76xf32, #tpu.memory_space<smem>>
    %272 = vector.broadcast %271 : f32 to vector<2x64xf32>
    %273 = arith.mulf %272, %260 : vector<2x64xf32>
    %c37 = arith.constant 37 : index
    %274 = memref.load %arg0[%c37] : memref<76xf32, #tpu.memory_space<smem>>
    %275 = vector.broadcast %274 : f32 to vector<2x64xf32>
    %276 = arith.mulf %275, %265 : vector<2x64xf32>
    %277 = arith.addf %273, %276 : vector<2x64xf32>
    %c38 = arith.constant 38 : index
    %278 = memref.load %arg0[%c38] : memref<76xf32, #tpu.memory_space<smem>>
    %279 = vector.broadcast %278 : f32 to vector<2x64xf32>
    %280 = arith.mulf %279, %270 : vector<2x64xf32>
    %281 = arith.addf %277, %280 : vector<2x64xf32>
    %c45 = arith.constant 45 : index
    %282 = memref.load %arg0[%c45] : memref<76xf32, #tpu.memory_space<smem>>
    %283 = vector.broadcast %282 : f32 to vector<2x64xf32>
    %284 = arith.addf %281, %283 : vector<2x64xf32>
    %c39 = arith.constant 39 : index
    %285 = memref.load %arg0[%c39] : memref<76xf32, #tpu.memory_space<smem>>
    %286 = vector.broadcast %285 : f32 to vector<2x64xf32>
    %287 = arith.mulf %286, %260 : vector<2x64xf32>
    %c40 = arith.constant 40 : index
    %288 = memref.load %arg0[%c40] : memref<76xf32, #tpu.memory_space<smem>>
    %289 = vector.broadcast %288 : f32 to vector<2x64xf32>
    %290 = arith.mulf %289, %265 : vector<2x64xf32>
    %291 = arith.addf %287, %290 : vector<2x64xf32>
    %c41 = arith.constant 41 : index
    %292 = memref.load %arg0[%c41] : memref<76xf32, #tpu.memory_space<smem>>
    %293 = vector.broadcast %292 : f32 to vector<2x64xf32>
    %294 = arith.mulf %293, %270 : vector<2x64xf32>
    %295 = arith.addf %291, %294 : vector<2x64xf32>
    %c46 = arith.constant 46 : index
    %296 = memref.load %arg0[%c46] : memref<76xf32, #tpu.memory_space<smem>>
    %297 = vector.broadcast %296 : f32 to vector<2x64xf32>
    %298 = arith.addf %295, %297 : vector<2x64xf32>
    %c42 = arith.constant 42 : index
    %299 = memref.load %arg0[%c42] : memref<76xf32, #tpu.memory_space<smem>>
    %300 = vector.broadcast %299 : f32 to vector<2x64xf32>
    %301 = arith.mulf %300, %260 : vector<2x64xf32>
    %c43 = arith.constant 43 : index
    %302 = memref.load %arg0[%c43] : memref<76xf32, #tpu.memory_space<smem>>
    %303 = vector.broadcast %302 : f32 to vector<2x64xf32>
    %304 = arith.mulf %303, %265 : vector<2x64xf32>
    %305 = arith.addf %301, %304 : vector<2x64xf32>
    %c44 = arith.constant 44 : index
    %306 = memref.load %arg0[%c44] : memref<76xf32, #tpu.memory_space<smem>>
    %307 = vector.broadcast %306 : f32 to vector<2x64xf32>
    %308 = arith.mulf %307, %270 : vector<2x64xf32>
    %309 = arith.addf %305, %308 : vector<2x64xf32>
    %c47 = arith.constant 47 : index
    %310 = memref.load %arg0[%c47] : memref<76xf32, #tpu.memory_space<smem>>
    %311 = vector.broadcast %310 : f32 to vector<2x64xf32>
    %312 = arith.addf %309, %311 : vector<2x64xf32>
    %cst_18 = arith.constant 0.000000e+00 : f32
    %cst_19 = arith.constant 6.000000e+00 : f32
    %313 = vector.broadcast %cst_18 : f32 to vector<2x64xf32>
    %314 = arith.maximumf %313, %284 : vector<2x64xf32>
    %315 = vector.broadcast %cst_19 : f32 to vector<2x64xf32>
    %316 = arith.minimumf %315, %314 : vector<2x64xf32>
    %cst_20 = arith.constant 0.000000e+00 : f32
    %cst_21 = arith.constant 6.000000e+00 : f32
    %317 = vector.broadcast %cst_20 : f32 to vector<2x64xf32>
    %318 = arith.maximumf %317, %298 : vector<2x64xf32>
    %319 = vector.broadcast %cst_21 : f32 to vector<2x64xf32>
    %320 = arith.minimumf %319, %318 : vector<2x64xf32>
    %cst_22 = arith.constant 0.000000e+00 : f32
    %cst_23 = arith.constant 6.000000e+00 : f32
    %321 = vector.broadcast %cst_22 : f32 to vector<2x64xf32>
    %322 = arith.maximumf %321, %312 : vector<2x64xf32>
    %323 = vector.broadcast %cst_23 : f32 to vector<2x64xf32>
    %324 = arith.minimumf %323, %322 : vector<2x64xf32>
    %c48 = arith.constant 48 : index
    %325 = memref.load %arg0[%c48] : memref<76xf32, #tpu.memory_space<smem>>
    %326 = vector.broadcast %325 : f32 to vector<2x64xf32>
    %327 = arith.mulf %326, %316 : vector<2x64xf32>
    %c49 = arith.constant 49 : index
    %328 = memref.load %arg0[%c49] : memref<76xf32, #tpu.memory_space<smem>>
    %329 = vector.broadcast %328 : f32 to vector<2x64xf32>
    %330 = arith.mulf %329, %320 : vector<2x64xf32>
    %331 = arith.addf %327, %330 : vector<2x64xf32>
    %c50 = arith.constant 50 : index
    %332 = memref.load %arg0[%c50] : memref<76xf32, #tpu.memory_space<smem>>
    %333 = vector.broadcast %332 : f32 to vector<2x64xf32>
    %334 = arith.mulf %333, %324 : vector<2x64xf32>
    %335 = arith.addf %331, %334 : vector<2x64xf32>
    %c57 = arith.constant 57 : index
    %336 = memref.load %arg0[%c57] : memref<76xf32, #tpu.memory_space<smem>>
    %337 = vector.broadcast %336 : f32 to vector<2x64xf32>
    %338 = arith.addf %335, %337 : vector<2x64xf32>
    %c51 = arith.constant 51 : index
    %339 = memref.load %arg0[%c51] : memref<76xf32, #tpu.memory_space<smem>>
    %340 = vector.broadcast %339 : f32 to vector<2x64xf32>
    %341 = arith.mulf %340, %316 : vector<2x64xf32>
    %c52 = arith.constant 52 : index
    %342 = memref.load %arg0[%c52] : memref<76xf32, #tpu.memory_space<smem>>
    %343 = vector.broadcast %342 : f32 to vector<2x64xf32>
    %344 = arith.mulf %343, %320 : vector<2x64xf32>
    %345 = arith.addf %341, %344 : vector<2x64xf32>
    %c53 = arith.constant 53 : index
    %346 = memref.load %arg0[%c53] : memref<76xf32, #tpu.memory_space<smem>>
    %347 = vector.broadcast %346 : f32 to vector<2x64xf32>
    %348 = arith.mulf %347, %324 : vector<2x64xf32>
    %349 = arith.addf %345, %348 : vector<2x64xf32>
    %c58 = arith.constant 58 : index
    %350 = memref.load %arg0[%c58] : memref<76xf32, #tpu.memory_space<smem>>
    %351 = vector.broadcast %350 : f32 to vector<2x64xf32>
    %352 = arith.addf %349, %351 : vector<2x64xf32>
    %c54 = arith.constant 54 : index
    %353 = memref.load %arg0[%c54] : memref<76xf32, #tpu.memory_space<smem>>
    %354 = vector.broadcast %353 : f32 to vector<2x64xf32>
    %355 = arith.mulf %354, %316 : vector<2x64xf32>
    %c55 = arith.constant 55 : index
    %356 = memref.load %arg0[%c55] : memref<76xf32, #tpu.memory_space<smem>>
    %357 = vector.broadcast %356 : f32 to vector<2x64xf32>
    %358 = arith.mulf %357, %320 : vector<2x64xf32>
    %359 = arith.addf %355, %358 : vector<2x64xf32>
    %c56 = arith.constant 56 : index
    %360 = memref.load %arg0[%c56] : memref<76xf32, #tpu.memory_space<smem>>
    %361 = vector.broadcast %360 : f32 to vector<2x64xf32>
    %362 = arith.mulf %361, %324 : vector<2x64xf32>
    %363 = arith.addf %359, %362 : vector<2x64xf32>
    %c59 = arith.constant 59 : index
    %364 = memref.load %arg0[%c59] : memref<76xf32, #tpu.memory_space<smem>>
    %365 = vector.broadcast %364 : f32 to vector<2x64xf32>
    %366 = arith.addf %363, %365 : vector<2x64xf32>
    %367 = arith.addf %338, %260 : vector<2x64xf32>
    %cst_24 = arith.constant 0.000000e+00 : f32
    %cst_25 = arith.constant 6.000000e+00 : f32
    %368 = vector.broadcast %cst_24 : f32 to vector<2x64xf32>
    %369 = arith.maximumf %368, %367 : vector<2x64xf32>
    %370 = vector.broadcast %cst_25 : f32 to vector<2x64xf32>
    %371 = arith.minimumf %370, %369 : vector<2x64xf32>
    %372 = arith.addf %352, %265 : vector<2x64xf32>
    %cst_26 = arith.constant 0.000000e+00 : f32
    %cst_27 = arith.constant 6.000000e+00 : f32
    %373 = vector.broadcast %cst_26 : f32 to vector<2x64xf32>
    %374 = arith.maximumf %373, %372 : vector<2x64xf32>
    %375 = vector.broadcast %cst_27 : f32 to vector<2x64xf32>
    %376 = arith.minimumf %375, %374 : vector<2x64xf32>
    %377 = arith.addf %366, %270 : vector<2x64xf32>
    %cst_28 = arith.constant 0.000000e+00 : f32
    %cst_29 = arith.constant 6.000000e+00 : f32
    %378 = vector.broadcast %cst_28 : f32 to vector<2x64xf32>
    %379 = arith.maximumf %378, %377 : vector<2x64xf32>
    %380 = vector.broadcast %cst_29 : f32 to vector<2x64xf32>
    %381 = arith.minimumf %380, %379 : vector<2x64xf32>
    %cst_30 = arith.constant dense<0.000000e+00> : vector<2xf32>
    %382 = vector.multi_reduction <add>, %371, %cst_30 [1] : vector<2x64xf32> to vector<2xf32>
    %383 = vector.shape_cast %382 : vector<2xf32> to vector<2x1xf32>
    %cst_31 = arith.constant 1.562500e-02 : f32
    %384 = vector.broadcast %cst_31 : f32 to vector<2x1xf32>
    %385 = arith.mulf %383, %384 : vector<2x1xf32>
    %cst_32 = arith.constant dense<0.000000e+00> : vector<2xf32>
    %386 = vector.multi_reduction <add>, %376, %cst_32 [1] : vector<2x64xf32> to vector<2xf32>
    %387 = vector.shape_cast %386 : vector<2xf32> to vector<2x1xf32>
    %cst_33 = arith.constant 1.562500e-02 : f32
    %388 = vector.broadcast %cst_33 : f32 to vector<2x1xf32>
    %389 = arith.mulf %387, %388 : vector<2x1xf32>
    %cst_34 = arith.constant dense<0.000000e+00> : vector<2xf32>
    %390 = vector.multi_reduction <add>, %381, %cst_34 [1] : vector<2x64xf32> to vector<2xf32>
    %391 = vector.shape_cast %390 : vector<2xf32> to vector<2x1xf32>
    %cst_35 = arith.constant 1.562500e-02 : f32
    %392 = vector.broadcast %cst_35 : f32 to vector<2x1xf32>
    %393 = arith.mulf %391, %392 : vector<2x1xf32>
    %c60 = arith.constant 60 : index
    %394 = memref.load %arg0[%c60] : memref<76xf32, #tpu.memory_space<smem>>
    %395 = vector.broadcast %394 : f32 to vector<2x1xf32>
    %396 = arith.mulf %395, %385 : vector<2x1xf32>
    %c61 = arith.constant 61 : index
    %397 = memref.load %arg0[%c61] : memref<76xf32, #tpu.memory_space<smem>>
    %398 = vector.broadcast %397 : f32 to vector<2x1xf32>
    %399 = arith.mulf %398, %389 : vector<2x1xf32>
    %400 = arith.addf %396, %399 : vector<2x1xf32>
    %c62 = arith.constant 62 : index
    %401 = memref.load %arg0[%c62] : memref<76xf32, #tpu.memory_space<smem>>
    %402 = vector.broadcast %401 : f32 to vector<2x1xf32>
    %403 = arith.mulf %402, %393 : vector<2x1xf32>
    %404 = arith.addf %400, %403 : vector<2x1xf32>
    %c72 = arith.constant 72 : index
    %405 = memref.load %arg0[%c72] : memref<76xf32, #tpu.memory_space<smem>>
    %406 = vector.broadcast %405 : f32 to vector<2x1xf32>
    %407 = arith.addf %404, %406 : vector<2x1xf32>
    %c63 = arith.constant 63 : index
    %408 = memref.load %arg0[%c63] : memref<76xf32, #tpu.memory_space<smem>>
    %409 = vector.broadcast %408 : f32 to vector<2x1xf32>
    %410 = arith.mulf %409, %385 : vector<2x1xf32>
    %c64 = arith.constant 64 : index
    %411 = memref.load %arg0[%c64] : memref<76xf32, #tpu.memory_space<smem>>
    %412 = vector.broadcast %411 : f32 to vector<2x1xf32>
    %413 = arith.mulf %412, %389 : vector<2x1xf32>
    %414 = arith.addf %410, %413 : vector<2x1xf32>
    %c65 = arith.constant 65 : index
    %415 = memref.load %arg0[%c65] : memref<76xf32, #tpu.memory_space<smem>>
    %416 = vector.broadcast %415 : f32 to vector<2x1xf32>
    %417 = arith.mulf %416, %393 : vector<2x1xf32>
    %418 = arith.addf %414, %417 : vector<2x1xf32>
    %c73 = arith.constant 73 : index
    %419 = memref.load %arg0[%c73] : memref<76xf32, #tpu.memory_space<smem>>
    %420 = vector.broadcast %419 : f32 to vector<2x1xf32>
    %421 = arith.addf %418, %420 : vector<2x1xf32>
    %c66 = arith.constant 66 : index
    %422 = memref.load %arg0[%c66] : memref<76xf32, #tpu.memory_space<smem>>
    %423 = vector.broadcast %422 : f32 to vector<2x1xf32>
    %424 = arith.mulf %423, %385 : vector<2x1xf32>
    %c67 = arith.constant 67 : index
    %425 = memref.load %arg0[%c67] : memref<76xf32, #tpu.memory_space<smem>>
    %426 = vector.broadcast %425 : f32 to vector<2x1xf32>
    %427 = arith.mulf %426, %389 : vector<2x1xf32>
    %428 = arith.addf %424, %427 : vector<2x1xf32>
    %c68 = arith.constant 68 : index
    %429 = memref.load %arg0[%c68] : memref<76xf32, #tpu.memory_space<smem>>
    %430 = vector.broadcast %429 : f32 to vector<2x1xf32>
    %431 = arith.mulf %430, %393 : vector<2x1xf32>
    %432 = arith.addf %428, %431 : vector<2x1xf32>
    %c74 = arith.constant 74 : index
    %433 = memref.load %arg0[%c74] : memref<76xf32, #tpu.memory_space<smem>>
    %434 = vector.broadcast %433 : f32 to vector<2x1xf32>
    %435 = arith.addf %432, %434 : vector<2x1xf32>
    %c69 = arith.constant 69 : index
    %436 = memref.load %arg0[%c69] : memref<76xf32, #tpu.memory_space<smem>>
    %437 = vector.broadcast %436 : f32 to vector<2x1xf32>
    %438 = arith.mulf %437, %385 : vector<2x1xf32>
    %c70 = arith.constant 70 : index
    %439 = memref.load %arg0[%c70] : memref<76xf32, #tpu.memory_space<smem>>
    %440 = vector.broadcast %439 : f32 to vector<2x1xf32>
    %441 = arith.mulf %440, %389 : vector<2x1xf32>
    %442 = arith.addf %438, %441 : vector<2x1xf32>
    %c71 = arith.constant 71 : index
    %443 = memref.load %arg0[%c71] : memref<76xf32, #tpu.memory_space<smem>>
    %444 = vector.broadcast %443 : f32 to vector<2x1xf32>
    %445 = arith.mulf %444, %393 : vector<2x1xf32>
    %446 = arith.addf %442, %445 : vector<2x1xf32>
    %c75 = arith.constant 75 : index
    %447 = memref.load %arg0[%c75] : memref<76xf32, #tpu.memory_space<smem>>
    %448 = vector.broadcast %447 : f32 to vector<2x1xf32>
    %449 = arith.addf %446, %448 : vector<2x1xf32>
    %450 = tpu.concatenate %407, %421, %435, %449 in 1 : vector<2x1xf32>, vector<2x1xf32>, vector<2x1xf32>, vector<2x1xf32> -> vector<2x4xf32>
    %c0_36 = arith.constant 0 : index
    %c0_37 = arith.constant 0 : index
    %451 = vector.load %arg2[%c0_36, %c0_37] : memref<2x4xf32, #tpu.memory_space<vmem>>, vector<2x4xf32>
    tpu.vector_store %arg2[%c0_36, %c0_37], %450 {strides = array<i32>} : memref<2x4xf32, #tpu.memory_space<vmem>>, vector<2x4xf32>,
    return
  }
}

</mosaic_0001>

<bundles_post_ra>
// kernel: toy_model_forward.1
= control target key start
LH: loop header
LB: loop body
LE: loop exit
PB: predicated region body
PF: predicated region fallthrough
CT: control target
= control target key end

     0   :  { %7 = vsyncpa [#allocation5], 0  ;;  %s2234_s0 = inlined_call_operand.vmem [shape: f32[76], index: 0, kind: input, shape index: {}]   ;;  %s2235_s1 = inlined_call_operand.hbm [shape: f32[2,3,16,16], index: 1, kind: input, shape index: {}]   ;;  %s2236_s2 = inlined_call_operand.hbm [shape: f32[2,4], index: 2, kind: output, shape index: {}]  }
   0x1   :  { %8 = vsyncpa [#allocation3], 0 }
   0x2   :  { %9 = vsyncpa [#allocation4], 0  ;;  %s16_s11 = sshll.u32 %s2234_s0, 4  ;;  %s17_s11 = int_to_ptr.vmem [resolvable:$true] %s16_s11 }
   0x3   :  { %s1231_s12 = scalar_lea.vmem %s17_s11, 16  ;;  %p1236_p1 = scmp.lt.s32.totalorder %s17_s11, %s17_s11 }
   0x4   :  { %p1232_p0 = scmp.ne.s32.totalorder %s17_s11, %s1231_s12  ;;  %p1237_p2 = scmp.lt.s32.totalorder %s1231_s12, %s1231_s12 }
   0x6   :  { %p1238_p3 = por %p1237_p2, %p1236_p1 }
   0x8   :  { %p1239_p4 = pnand %p1238_p3, %p1232_p0 }
   0xa   :  { %1242 = shalt.err (!%p1239_p4)
}
   0xb   :  { %s1293_s13 = smov [#allocation2]   ;;  %s1294_s14 = smov [#allocation6]  }
   0xc   :  { %19 = dma.vmem_to_smem %s17_s11, 16, %s1293_s13, [#allocation5]  }
   0xd   :  { %s25_s15 = sshll.u32 %s1294_s14, 4  ;;  %s1243_s18 = scalar_lea.hbm %s2235_s1, 1536  ;;  %s26_s15 = int_to_ptr.vmem [resolvable:$true] %s25_s15 }
   0xe   :  { %p1244_p5 = scmp.ne.s32.totalorder %s2235_s1, %s1243_s18  ;;  %p1247_p6 = scmp.lt.u32.totalorder %s1243_s18, %s2235_s1 }
  0x10   :  { %p1249_p7 = pnand %p1247_p6, %p1244_p5 }
  0x12   :  { %1252 = shalt.err (!%p1249_p7)
}
  0x13   :  { %s1253_s22 = scalar_lea.vmem %s26_s15, 1536  ;;  %p1258_p9 = scmp.lt.s32.totalorder %s26_s15, %s26_s15 }
  0x14   :  { %p1254_p8 = scmp.ne.s32.totalorder %s26_s15, %s1253_s22  ;;  %p1259_p10 = scmp.lt.s32.totalorder %s1253_s22, %s1253_s22 }
  0x16   :  { %p1260_p11 = por %p1259_p10, %p1258_p9 }
  0x18   :  { %p1261_p12 = pnand %p1260_p11, %p1254_p8 }
  0x1a   :  { %1264 = shalt.err (!%p1261_p12)
}
  0x1b   :  { %s1295_s23 = smov 128   ;;  %s1296_s24 = smov 8  }
  0x1c   :  { %31 = dma.hbm_to_vmem [thread:$0]  %s2235_s1, 1536, %s26_s15, [#allocation3], %s1295_s23, %s1295_s23, %s1296_s24  }
  0x1d   :  { %1287 = dma.done.wait [#allocation5], 16  }
  0x1e   :  { %1288 = vsyncadd [#allocation5], 4294967280 }
  0x1f   :  { %1289 = dma.done.wait [#allocation3], 1536  }
  0x20   :  { %1290 = vsyncadd [#allocation3], 4294965760 }
  0x21   :  { %38 = sfence }
  0x22   :  { %s1142_s27 = sld [smem:[#allocation2 + $0x3]]  ;;  %s1143_s28 = sld [smem:[#allocation2 + $0x4]]  ;;  %v39_v0 = vld [vmem:[#allocation6] sm:$0xff]  ;;  %v1341_v1 = vld [vmem:[#allocation6 + $0x30] sm:$0xff]  ;;  %v1366_v19 = vld [vmem:[#allocation6 + $0x8] sm:$0xff]  ;;  %vm495_vm0 = vcmask 7168  }
  0x23   :  { %s1144_s29 = sld [smem:[#allocation2 + $0x5]]  ;;  %s1145_s30 = sld [smem:[#allocation2 + $0xa]]  ;;  %v41_v2 = vld [vmem:[#allocation6 + $0x10] sm:$0xff]  ;;  %v43_v3 = vld [vmem:[#allocation6 + $0x20] sm:$0xff]  ;;  %v1370_v24 = vld [vmem:[#allocation6 + $0x18] sm:$0xff]  ;;  %vm508_vm1 = vcmask 15360  }
  0x24   :  { %s51_s3 = sld [smem:[#allocation2]]  ;;  %s1139_s4 = sld [smem:[#allocation2 + $0x1]]  ;;  %v1345_v5 = vld [vmem:[#allocation6 + $0x40] sm:$0xff]  ;;  %v49_v14 = vld [vmem:[#allocation6 + $0x50] sm:$0xff]  ;;  %v1372_v25 = vld [vmem:[#allocation6 + $0x28] sm:$0xff]  ;;  %vm521_vm2 = vcmask 23552  }
  0x25   :  { %s1140_s5 = sld [smem:[#allocation2 + $0x2]]  ;;  %s1141_s6 = sld [smem:[#allocation2 + $0x9]]  ;;  %v1391_v46 = vld [vmem:[#allocation6 + $0x38] sm:$0xff]  ;;  %v1400_v51 = vld [vmem:[#allocation6 + $0x48] sm:$0xff]  ;;  %vm534_vm3 = vcmask 31744   ;;  %vm547_vm4 = vcmask 39936  }
  0x26   :  { %s1347_s1 = sld [smem:[#allocation2 + $0x6]]  ;;  %s1349_s7 = sld [smem:[#allocation2 + $0x7]]  ;;  %v1402_v52 = vld [vmem:[#allocation6 + $0x58] sm:$0xff]  ;;  %vm560_vm5 = vcmask 48128   ;;  %vm573_vm6 = vcmask 56320   ;;  %vm689_vm7 = vcmask 1041409  }
  0x27   :  { %s1362_s8 = sld [smem:[#allocation2 + $0x8]]  ;;  %s1377_s9 = sld [smem:[#allocation2 + $0xb]]  ;;  %vm692_vm8 = vcmask 1042434   ;;  %vm695_vm9 = vcmask 1043459   ;;  %vm698_vm10 = vcmask 1044484   ;;  %vm701_vm11 = vcmask 1045509  }
  0x28   :  { %v1343_v4 = vstv %s1142_s27  ;;  %v1352_v7 = vstv %s1143_s28  ;;  %s1297_s10 = smov 127   ;;  %s1298_s11 = smov 126   ;;  %vm814_vm12 = vcmask 64512   ;;  %vm816_vm13 = vcmask 130048  }
  0x29   :  { %v85_v6 = vmul.f32 %v1343_v4, %v39_v0  ;;  %v1354_v8 = vstv %s1144_s29  ;;  %v87_v9 = vmul.f32 %v1343_v4, %v1341_v1  ;;  %v91_v10 = vmul.f32 %v1352_v7, %v41_v2  ;;  %s1299_s12 = smov 125   ;;  %s1300_s13 = smov 124  }
  0x2a   :  { %v101_v11 = vmul.f32 %v1354_v8, %v43_v3  ;;  %v1360_v12 = vstv %s1145_s30  ;;  %v52_v13 = vstv %s51_s3  ;;  %v58_v16 = vstv %s1139_s4  ;;  %s1301_s14 = smov 123   ;;  %s1302_s15 = smov 122  }
  0x2b   :  { %v53_v15 = vmul.f32 %v52_v13, %v39_v0  ;;  %v68_v17 = vstv %s1140_s5  ;;  %v93_v18 = vmul.f32 %v1352_v7, %v1345_v5  ;;  %v95_v20 = vadd.f32 %v91_v10, %v85_v6  ;;  %s1303_s16 = smov 16   ;;  %s1304_s17 = smov 24  }
  0x2c   :  { %v59_v21 = vmul.f32 %v58_v16, %v41_v2  ;;  %v69_v22 = vmul.f32 %v68_v17, %v43_v3  ;;  %v1368_v23 = vstv %s1141_s6  ;;  %v103_v27 = vmul.f32 %v1354_v8, %v49_v14  ;;  %s1305_s18 = smov 40   ;;  %s1306_s19 = smov 32  }
  0x2d   :  { %v97_v26 = vadd.f32 %v93_v18, %v87_v9  ;;  %v55_v28 = vmul.f32 %v52_v13, %v1341_v1  ;;  %v61_v29 = vmul.f32 %v58_v16, %v1345_v5  ;;  %v105_v30 = vadd.f32 %v101_v11, %v95_v20  ;;  %s1307_s20 = smov 56   ;;  %s1308_s0 = smov 48  }
  0x2e   :  { %v63_v31 = vadd.f32 %v59_v21, %v53_v15  ;;  %v71_v32 = vmul.f32 %v68_v17, %v49_v14  ;;  %v54_v33 = vmul.f32 %v52_v13, %v1366_v19  ;;  %v60_v36 = vmul.f32 %v58_v16, %v1370_v24  ;;  %s1995_s21 = sld [smem:[#allocation2 + $0xd]]  ;;  %s1997_s22 = sld [smem:[#allocation2 + $0xe]] }
  0x2f   :  { %v107_v34 = vadd.f32 %v103_v27, %v97_v26  ;;  %v65_v35 = vadd.f32 %v61_v29, %v55_v28  ;;  %v70_v37 = vmul.f32 %v68_v17, %v1372_v25  ;;  %v111_v38 = vadd.f32 %v1360_v12, %v105_v30  ;;  %s1999_s23 = sld [smem:[#allocation2 + $0x10]]  ;;  %s2003_s25 = sld [smem:[#allocation2 + $0x13]] }
  0x30   :  { %v73_v39 = vadd.f32 %v69_v22, %v63_v31  ;;  %v1384_v40 = vstv %s1347_s1  ;;  %v1387_v41 = vstv %s1349_s7  ;;  %v64_v44 = vadd.f32 %v60_v36, %v54_v33  ;;  %s2005_s26 = sld [smem:[#allocation2 + $0xc]]  ;;  %s2009_s28 = sld [smem:[#allocation2 + $0xf]] }
  0x31   :  { %v113_v42 = vadd.f32 %v1360_v12, %v107_v34  ;;  %v75_v43 = vadd.f32 %v71_v32, %v65_v35  ;;  %v117_v45 = vmul.f32 %v1384_v40, %v39_v0  ;;  %v1393_v47 = vmax.f32 %v111_v38, 0.0  ;;  %s2007_s27 = sld [smem:[#allocation2 + $0x14]]  ;;  %s2011_s29 = sld [smem:[#allocation2 + $0x12]] }
  0x32   :  { %v79_v48 = vadd.f32 %v1368_v23, %v73_v39  ;;  %v123_v49 = vmul.f32 %v1387_v41, %v41_v2  ;;  %v1398_v50 = vstv %s1362_s8  ;;  %v74_v54 = vadd.f32 %v70_v37, %v64_v44  ;;  %s2013_s30 = sld [smem:[#allocation2 + $0x15]]  ;;  %s2019_s3 = sld [smem:[#allocation2 + $0x16]] }
  0x33   :  { %v81_v53 = vadd.f32 %v1368_v23, %v75_v43  ;;  %v133_v55 = vmul.f32 %v1398_v50, %v43_v3  ;;  %179 = vrot.lane.b32.xlu1 %v1393_v47, %s1297_s10  ;;  %v1410_v57 = vmax.f32 %v113_v42, 0.0  ;;  %v56_v59 = vmul.f32 %v52_v13, %v1391_v46  ;;  %s2022_s4 = sld [smem:[#allocation2 + $0x17]]  ;;  %s2037_s5 = sld [smem:[#allocation2 + $0x18]] }
  0x34   :  { %v1408_v56 = vmax.f32 %v79_v48, 0.0  ;;  %v127_v58 = vadd.f32 %v123_v49, %v117_v45  ;;  %v80_v60 = vadd.f32 %v1368_v23, %v74_v54  ;;  %v1415_v61 = vstv %s1377_s9  ;;  %s2041_s6 = sld [smem:[#allocation2 + $0x1b]]  ;;  %s2043_s1 = sld [smem:[#allocation2 + $0x1e]] }
  0x35   :  { %v62_v62 = vmul.f32 %v58_v16, %v1400_v51  ;;  %v72_v63 = vmul.f32 %v68_v17, %v1402_v52  ;;  %v1421_v0 = vmax.f32 %v81_v53, 0.0  ;;  %v119_v3 = vmul.f32 %v1384_v40, %v1341_v1  ;;  %s2046_s7 = sld [smem:[#allocation2 + $0x19]]  ;;  %s2048_s8 = sld [smem:[#allocation2 + $0x1c]] }
  0x36   :  { %171 = vrot.lane.b32.xlu0 %v1408_v56, %s1297_s10  ;;  %v137_v2 = vadd.f32 %v133_v55, %v127_v58  ;;  %v125_v6 = vmul.f32 %v1387_v41, %v1345_v5  ;;  %v135_v10 = vmul.f32 %v1398_v50, %v49_v14  ;;  %v86_v11 = vmul.f32 %v1343_v4, %v1366_v19  ;;  %s2050_s9 = sld [smem:[#allocation2 + $0x1a]] }
  0x37   :  { %v66_v9 = vadd.f32 %v62_v62, %v56_v59  ;;  %v92_v13 = vmul.f32 %v1352_v7, %v1370_v24  ;;  %183 = vrot.lane.b32.xlu1 %v1410_v57, %s1297_s10  ;;  %v1434_v15 = vmax.f32 %v80_v60, 0.0  ;;  %v88_v5 = vmul.f32 %v1343_v4, %v1391_v46 }
  0x38   :  { %v143_v16 = vadd.f32 %v1415_v61, %v137_v2  ;;  %v129_v1 = vadd.f32 %v125_v6, %v119_v3  ;;  %v94_v14 = vmul.f32 %v1352_v7, %v1400_v51  ;;  %v102_v20 = vmul.f32 %v1354_v8, %v1372_v25 }
  0x39   :  { %v76_v17 = vadd.f32 %v72_v63, %v66_v9  ;;  %v96_v18 = vadd.f32 %v92_v13, %v86_v11  ;;  %v104_v27 = vmul.f32 %v1354_v8, %v1402_v52  ;;  %v118_v30 = vmul.f32 %v1384_v40, %v1366_v19 }
  0x3a   :  { %175 = vrot.lane.b32.xlu0 %v1421_v0, %s1297_s10  ;;  %v1448_v22 = vmax.f32 %v143_v16, 0.0  ;;  %v139_v26 = vadd.f32 %v135_v10, %v129_v1  ;;  %v98_v4 = vadd.f32 %v94_v14, %v88_v5  ;;  %v124_v31 = vmul.f32 %v1387_v41, %v1370_v24 }
  0x3b   :  { %v82_v21 = vadd.f32 %v1368_v23, %v76_v17  ;;  %173 = vrot.lane.b32.xlu1 %v1434_v15, %s1297_s10  ;;  %v106_v28 = vadd.f32 %v102_v20, %v96_v18  ;;  %v134_v35 = vmul.f32 %v1398_v50, %v1372_v25  ;;  %v126_v25 = vmul.f32 %v1387_v41, %v1400_v51 }
  0x3c   :  { %v145_v23 = vadd.f32 %v1415_v61, %v139_v26  ;;  %v108_v29 = vadd.f32 %v104_v27, %v98_v4  ;;  %v128_v34 = vadd.f32 %v124_v31, %v118_v30  ;;  %v136_v39 = vmul.f32 %v1398_v50, %v1402_v52 }
  0x3d   :  { %v1454_v7 = vmax.f32 %v82_v21, 0.0  ;;  %v112_v8 = vadd.f32 %v1360_v12, %v106_v28  ;;  %vm818_vm14 = vcmask 195584   ;;  %vm820_vm15 = vcmask 261120  }
  0x3e   :  { %219 = vrot.lane.b32.xlu0 %v1408_v56, %s1298_s11  ;;  %v1468_v32 = vmax.f32 %v145_v23, 0.0  ;;  %v114_v33 = vadd.f32 %v1360_v12, %v108_v29  ;;  %v138_v36 = vadd.f32 %v134_v35, %v128_v34  ;;  %v120_v12 = vmul.f32 %v1384_v40, %v1391_v46 }
  0x3f   :  { %187 = vrot.lane.b32.xlu1 %v1448_v22, %s1297_s10  ;;  %v1475_v19 = vmax.f32 %v112_v8, 0.0 }
  0x40   :  { %v1479_v24 = vmax.f32 %v114_v33, 0.0  ;;  %v144_v37 = vadd.f32 %v1415_v61, %v138_v36  ;;  %v130_v38 = vadd.f32 %v126_v25, %v120_v12 }
  0x42   :  { %177 = vrot.lane.b32.xlu0 %v1454_v7, %s1297_s10  ;;  %v1496_v42 = vmax.f32 %v144_v37, 0.0  ;;  %v140_v40 = vadd.f32 %v136_v39, %v130_v38 }
  0x43   :  { %227 = vrot.lane.b32.xlu1 %v1393_v47, %s1298_s11 }
  0x44   :  { %v146_v41 = vadd.f32 %v1415_v61, %v140_v40 }
  0x46   :  { %223 = vrot.lane.b32.xlu0 %v1421_v0, %s1298_s11  ;;  %v1509_v43 = vmax.f32 %v146_v41, 0.0 }
  0x47   :  { %191 = vrot.lane.b32.xlu1 %v1468_v32, %s1297_s10 }
  0x4a   :  { %181 = vrot.lane.b32.xlu0 %v1475_v19, %s1297_s10 }
  0x4b   :  { %185 = vrot.lane.b32.xlu1 %v1479_v24, %s1297_s10 }
  0x4e   :  { %231 = vrot.lane.b32.xlu0 %v1410_v57, %s1298_s11 }
  0x4f   :  { %225 = vrot.lane.b32.xlu1 %v1454_v7, %s1298_s11 }
  0x52   :  { %221 = vrot.lane.b32.xlu0 %v1434_v15, %s1298_s11 }
  0x53   :  { %189 = vrot.lane.b32.xlu1 %v1496_v42, %s1297_s10 }
  0x56   :  { %235 = vrot.lane.b32.xlu0 %v1448_v22, %s1298_s11 }
  0x57   :  { %239 = vrot.lane.b32.xlu1 %v1468_v32, %s1298_s11 }
  0x5a   :  { %229 = vrot.lane.b32.xlu0 %v1475_v19, %s1298_s11 }
  0x5b   :  { %233 = vrot.lane.b32.xlu1 %v1479_v24, %s1298_s11 }
  0x5e   :  { %193 = vrot.lane.b32.xlu0 %v1509_v43, %s1297_s10 }
  0x5f   :  { %241 = vrot.lane.b32.xlu1 %v1509_v43, %s1298_s11 }
  0x62   :  { %237 = vrot.lane.b32.xlu0 %v1496_v42, %s1298_s11 }
  0xa5   :  { %v180_v44 = vpop.permute.xlu1 %179 }
  0xa6   :  { %v1528_v55 = vmax.f32 %v1393_v47, %v180_v44 }
  0xa8   :  { %v172_v45 = vpop.permute.xlu0 %171 }
  0xa9   :  { %v184_v46 = vpop.permute.xlu1 %183  ;;  %v1520_v50 = vmax.f32 %v1408_v56, %v172_v45 }
  0xaa   :  { %v1544_v63 = vmax.f32 %v1410_v57, %v184_v46 }
  0xac   :  { %v176_v48 = vpop.permute.xlu0 %175 }
  0xad   :  { %v174_v49 = vpop.permute.xlu1 %173  ;;  %v1531_v59 = vmax.f32 %v1421_v0, %v176_v48 }
  0xae   :  { %v1556_v10 = vmax.f32 %v1434_v15, %v174_v49 }
  0xb0   :  { %v220_v51 = vpop.permute.xlu0 %219 }
  0xb1   :  { %v1523_v52 = vmax.f32 %v1520_v50, %v220_v51  ;;  %v188_v53 = vpop.permute.xlu1 %187 }
  0xb2   :  { %v1572_v15 = vmax.f32 %v1448_v22, %v188_v53 }
  0xb3   :  { %279 = vrot.lane.b32.xlu0 %v1523_v52, %s1297_s10 }
  0xb4   :  { %v178_v54 = vpop.permute.xlu0 %177 }
  0xb5   :  { %v228_v58 = vpop.permute.xlu1 %227  ;;  %v1559_v57 = vmax.f32 %v1454_v7, %v178_v54 }
  0xb6   :  { %v1534_v60 = vmax.f32 %v1528_v55, %v228_v58 }
  0xb8   :  { %v224_v56 = vpop.permute.xlu0 %223  ;;  %287 = vrot.lane.b32.xlu0 %v1534_v60, %s1297_s10  ;;  %v500_v35 = vsel %vm495_vm0, %v1528_v55, %v1534_v60 }
  0xb9   :  { %v1537_v61 = vmax.f32 %v1531_v59, %v224_v56  ;;  %v192_v62 = vpop.permute.xlu1 %191 }
  0xba   :  { %v1596_v21 = vmax.f32 %v1468_v32, %v192_v62  ;;  %v496_v32 = vsel %vm495_vm0, %v1520_v50, %v1523_v52 }
  0xbb   :  { %283 = vrot.lane.b32.xlu1 %v1537_v61, %s1297_s10  ;;  %v498_v12 = vsel %vm495_vm0, %v1531_v59, %v1537_v61 }
  0xbc   :  { %v182_v47 = vpop.permute.xlu0 %181 }
  0xbd   :  { %v186_v0 = vpop.permute.xlu1 %185  ;;  %v1586_v14 = vmax.f32 %v1475_v19, %v182_v47 }
  0xbe   :  { %v1618_v4 = vmax.f32 %v1479_v24, %v186_v0 }
  0xbf   :  { %315 = vrot.lane.b32.xlu1 %v1523_v52, %s1298_s11 }
  0xc0   :  { %v232_v2 = vpop.permute.xlu0 %231 }
  0xc1   :  { %v1549_v3 = vmax.f32 %v1544_v63, %v232_v2  ;;  %v226_v9 = vpop.permute.xlu1 %225 }
  0xc2   :  { %v1566_v11 = vmax.f32 %v1559_v57, %v226_v9 }
  0xc3   :  { %319 = vrot.lane.b32.xlu1 %v1537_v61, %s1298_s11  ;;  %291 = vrot.lane.b32.xlu0 %v1549_v3, %s1297_s10 }
  0xc4   :  { %v222_v6 = vpop.permute.xlu0 %221  ;;  %v499_v49 = vsel %vm495_vm0, %v1559_v57, %v1566_v11 }
  0xc5   :  { %v1569_v13 = vmax.f32 %v1556_v10, %v222_v6  ;;  %v190_v5 = vpop.permute.xlu1 %189 }
  0xc6   :  { %v1644_v28 = vmax.f32 %v1496_v42, %v190_v5  ;;  %v502_v42 = vsel %vm495_vm0, %v1544_v63, %v1549_v3 }
  0xc7   :  { %351 = vrot.lane.b32.xlu1 %v1523_v52, %s1299_s12  ;;  %323 = vrot.lane.b32.xlu0 %v1534_v60, %s1298_s11  ;;  %v497_v51 = vsel %vm495_vm0, %v1556_v10, %v1569_v13 }
  0xc8   :  { %v236_v16 = vpop.permute.xlu0 %235 }
  0xc9   :  { %v1579_v1 = vmax.f32 %v1572_v15, %v236_v16  ;;  %v240_v20 = vpop.permute.xlu1 %239 }
  0xca   :  { %v1603_v22 = vmax.f32 %v1596_v21, %v240_v20 }
  0xcb   :  { %285 = vrot.lane.b32.xlu1 %v1566_v11, %s1297_s10  ;;  %281 = vrot.lane.b32.xlu0 %v1569_v13, %s1297_s10  ;;  %v504_v58 = vsel %vm495_vm0, %v1572_v15, %v1579_v1 }
  0xcc   :  { %v230_v17 = vpop.permute.xlu0 %229  ;;  %v506_v57 = vsel %vm495_vm0, %v1596_v21, %v1603_v22 }
  0xcd   :  { %v1593_v18 = vmax.f32 %v1586_v14, %v230_v17  ;;  %v234_v26 = vpop.permute.xlu1 %233 }
  0xce   :  { %v1625_v27 = vmax.f32 %v1618_v4, %v234_v26 }
  0xcf   :  { %327 = vrot.lane.b32.xlu1 %v1549_v3, %s1298_s11  ;;  %295 = vrot.lane.b32.xlu0 %v1579_v1, %s1297_s10  ;;  %v501_v2 = vsel %vm495_vm0, %v1586_v14, %v1593_v18 }
  0xd0   :  { %v194_v7 = vpop.permute.xlu0 %193 }
  0xd1   :  { %v1670_v30 = vmax.f32 %v1509_v43, %v194_v7  ;;  %v242_v31 = vpop.permute.xlu1 %241 }
  0xd3   :  { %359 = vrot.lane.b32.xlu1 %v1534_v60, %s1299_s12  ;;  %355 = vrot.lane.b32.xlu0 %v1537_v61, %s1299_s12  ;;  %v1677_v8 = vmax.f32 %v1670_v30, %v242_v31 }
  0xd4   :  { %v238_v23 = vpop.permute.xlu0 %237 }
  0xd5   :  { %v1651_v29 = vmax.f32 %v1644_v28, %v238_v23 }
  0xd7   :  { %387 = vrot.lane.b32.xlu0 %v1523_v52, %s1300_s13  ;;  %289 = vrot.lane.b32.xlu1 %v1593_v18, %s1297_s10 }
  0xdb   :  { %299 = vrot.lane.b32.xlu0 %v1603_v22, %s1297_s10  ;;  %317 = vrot.lane.b32.xlu1 %v1569_v13, %s1298_s11 }
  0xdf   :  { %321 = vrot.lane.b32.xlu0 %v1566_v11, %s1298_s11  ;;  %331 = vrot.lane.b32.xlu1 %v1579_v1, %s1298_s11 }
  0xe3   :  { %363 = vrot.lane.b32.xlu0 %v1549_v3, %s1299_s12  ;;  %391 = vrot.lane.b32.xlu1 %v1537_v61, %s1300_s13 }
  0xe7   :  { %395 = vrot.lane.b32.xlu0 %v1534_v60, %s1300_s13  ;;  %423 = vrot.lane.b32.xlu1 %v1523_v52, %s1301_s14 }
  0xeb   :  { %293 = vrot.lane.b32.xlu0 %v1625_v27, %s1297_s10  ;;  %325 = vrot.lane.b32.xlu1 %v1593_v18, %s1298_s11 }
  0xef   :  { %335 = vrot.lane.b32.xlu0 %v1603_v22, %s1298_s11  ;;  %353 = vrot.lane.b32.xlu1 %v1569_v13, %s1299_s12 }
  0xf3   :  { %357 = vrot.lane.b32.xlu0 %v1566_v11, %s1299_s12  ;;  %367 = vrot.lane.b32.xlu1 %v1579_v1, %s1299_s12 }
  0xf7   :  { %399 = vrot.lane.b32.xlu0 %v1549_v3, %s1300_s13  ;;  %427 = vrot.lane.b32.xlu1 %v1537_v61, %s1301_s14 }
  0xfb   :  { %431 = vrot.lane.b32.xlu0 %v1534_v60, %s1301_s14  ;;  %459 = vrot.lane.b32.xlu1 %v1523_v52, %s1302_s15 }
  0xff   :  { %329 = vrot.lane.b32.xlu1 %v1625_v27, %s1298_s11  ;;  %297 = vrot.lane.b32.xlu0 %v1651_v29, %s1297_s10 }
 0x103   :  { %371 = vrot.lane.b32.xlu1 %v1603_v22, %s1299_s12  ;;  %361 = vrot.lane.b32.xlu0 %v1593_v18, %s1299_s12 }
 0x107   :  { %393 = vrot.lane.b32.xlu1 %v1566_v11, %s1300_s13  ;;  %389 = vrot.lane.b32.xlu0 %v1569_v13, %s1300_s13 }
 0x10b   :  { %435 = vrot.lane.b32.xlu1 %v1549_v3, %s1301_s14  ;;  %403 = vrot.lane.b32.xlu0 %v1579_v1, %s1300_s13 }
 0x10f   :  { %467 = vrot.lane.b32.xlu1 %v1534_v60, %s1302_s15  ;;  %463 = vrot.lane.b32.xlu0 %v1537_v61, %s1302_s15 }
 0x113   :  { %333 = vrot.lane.b32.xlu1 %v1651_v29, %s1298_s11  ;;  %301 = vrot.lane.b32.xlu0 %v1677_v8, %s1297_s10  ;;  %s2052_s10 = sld [smem:[#allocation2 + $0x1f]] }
 0x117   :  { %397 = vrot.lane.b32.xlu1 %v1593_v18, %s1300_s13  ;;  %365 = vrot.lane.b32.xlu0 %v1625_v27, %s1299_s12 }
 0x11b   :  { %425 = vrot.lane.b32.xlu1 %v1569_v13, %s1301_s14  ;;  %407 = vrot.lane.b32.xlu0 %v1603_v22, %s1300_s13 }
 0x11f   :  { %439 = vrot.lane.b32.xlu1 %v1579_v1, %s1301_s14  ;;  %429 = vrot.lane.b32.xlu0 %v1566_v11, %s1301_s14 }
 0x123   :  { %337 = vrot.lane.b32.xlu1 %v1677_v8, %s1298_s11  ;;  %471 = vrot.lane.b32.xlu0 %v1549_v3, %s1302_s15  ;;  %s2056_s11 = sld [smem:[#allocation2 + $0x1d]] }
 0x125   :  { %v280_v33 = vpop.permute.xlu0 %279 }
 0x126   :  { %v509_v34 = vsel %vm508_vm1, %v496_v32, %v280_v33  ;;  %v503_v32 = vsel %vm495_vm0, %v1618_v4, %v1625_v27 }
 0x127   :  { %401 = vrot.lane.b32.xlu1 %v1625_v27, %s1300_s13  ;;  %369 = vrot.lane.b32.xlu0 %v1651_v29, %s1299_s12 }
 0x12a   :  { %v288_v19 = vpop.permute.xlu0 %287 }
 0x12b   :  { %443 = vrot.lane.b32.xlu1 %v1603_v22, %s1301_s14  ;;  %433 = vrot.lane.b32.xlu0 %v1593_v18, %s1301_s14  ;;  %v513_v24 = vsel %vm508_vm1, %v500_v35, %v288_v19 }
 0x12d   :  { %v284_v36 = vpop.permute.xlu1 %283 }
 0x12e   :  { %v511_v25 = vsel %vm508_vm1, %v498_v12, %v284_v36 }
 0x12f   :  { %465 = vrot.lane.b32.xlu1 %v1566_v11, %s1302_s15  ;;  %461 = vrot.lane.b32.xlu0 %v1569_v13, %s1302_s15 }
 0x131   :  { %v316_v37 = vpop.permute.xlu1 %315 }
 0x132   :  { %v522_v38 = vsel %vm521_vm2, %v509_v34, %v316_v37 }
 0x133   :  { %373 = vrot.lane.b32.xlu1 %v1677_v8, %s1299_s12  ;;  %475 = vrot.lane.b32.xlu0 %v1579_v1, %s1302_s15  ;;  %s2058_s12 = sld [smem:[#allocation2 + $0x20]] }
 0x135   :  { %v320_v39 = vpop.permute.xlu1 %319  ;;  %v292_v40 = vpop.permute.xlu0 %291 }
 0x136   :  { %v524_v41 = vsel %vm521_vm2, %v511_v25, %v320_v39  ;;  %v515_v43 = vsel %vm508_vm1, %v502_v42, %v292_v40 }
 0x137   :  { %437 = vrot.lane.b32.xlu1 %v1625_v27, %s1301_s14  ;;  %405 = vrot.lane.b32.xlu0 %v1651_v29, %s1300_s13 }
 0x139   :  { %v352_v44 = vpop.permute.xlu1 %351  ;;  %v324_v45 = vpop.permute.xlu0 %323 }
 0x13a   :  { %v535_v46 = vsel %vm534_vm3, %v522_v38, %v352_v44  ;;  %v526_v48 = vsel %vm521_vm2, %v513_v24, %v324_v45  ;;  %v505_v44 = vsel %vm495_vm0, %v1644_v28, %v1651_v29 }
 0x13b   :  { %479 = vrot.lane.b32.xlu1 %v1603_v22, %s1302_s15  ;;  %469 = vrot.lane.b32.xlu0 %v1593_v18, %s1302_s15 }
 0x13d   :  { %v286_v50 = vpop.permute.xlu1 %285  ;;  %v282_v52 = vpop.permute.xlu0 %281 }
 0x13e   :  { %v512_v53 = vsel %vm508_vm1, %v499_v49, %v286_v50  ;;  %v510_v54 = vsel %vm508_vm1, %v497_v51, %v282_v52 }
 0x13f   :  { %441 = vrot.lane.b32.xlu1 %v1651_v29, %s1301_s14  ;;  %409 = vrot.lane.b32.xlu0 %v1677_v8, %s1300_s13  ;;  %s2061_s13 = sld [smem:[#allocation2 + $0x21]] }
 0x141   :  { %v328_v55 = vpop.permute.xlu1 %327  ;;  %v296_v59 = vpop.permute.xlu0 %295 }
 0x142   :  { %v528_v60 = vsel %vm521_vm2, %v515_v43, %v328_v55  ;;  %v517_v56 = vsel %vm508_vm1, %v504_v58, %v296_v59 }
 0x143   :  { %445 = vrot.lane.b32.xlu1 %v1677_v8, %s1301_s14  ;;  %473 = vrot.lane.b32.xlu0 %v1625_v27, %s1302_s15  ;;  %s2063_s14 = sld [smem:[#allocation2 + $0x22]] }
 0x145   :  { %v360_v61 = vpop.permute.xlu1 %359  ;;  %v356_v62 = vpop.permute.xlu0 %355 }
 0x146   :  { %v539_v47 = vsel %vm534_vm3, %v526_v48, %v360_v61  ;;  %v537_v63 = vsel %vm534_vm3, %v524_v41, %v356_v62 }
 0x147   :  { %481 = vrot.lane.b32.xlu1 %v1677_v8, %s1302_s15  ;;  %477 = vrot.lane.b32.xlu0 %v1651_v29, %s1302_s15  ;;  %s2067_s15 = sld [smem:[#allocation2 + $0x23]] }
 0x149   :  { %v290_v0 = vpop.permute.xlu1 %289  ;;  %v388_v3 = vpop.permute.xlu0 %387 }
 0x14a   :  { %v514_v6 = vsel %vm508_vm1, %v501_v2, %v290_v0  ;;  %v548_v9 = vsel %vm547_vm4, %v535_v46, %v388_v3 }
 0x14d   :  { %v318_v10 = vpop.permute.xlu1 %317  ;;  %v300_v11 = vpop.permute.xlu0 %299 }
 0x14e   :  { %v523_v13 = vsel %vm521_vm2, %v510_v54, %v318_v10  ;;  %v519_v16 = vsel %vm508_vm1, %v506_v57, %v300_v11 }
 0x151   :  { %v332_v15 = vpop.permute.xlu1 %331  ;;  %v322_v1 = vpop.permute.xlu0 %321 }
 0x152   :  { %v530_v5 = vsel %vm521_vm2, %v517_v56, %v332_v15  ;;  %v525_v17 = vsel %vm521_vm2, %v512_v53, %v322_v1 }
 0x155   :  { %v392_v14 = vpop.permute.xlu1 %391  ;;  %v364_v18 = vpop.permute.xlu0 %363 }
 0x156   :  { %v550_v20 = vsel %vm547_vm4, %v537_v63, %v392_v14  ;;  %v541_v26 = vsel %vm534_vm3, %v528_v60, %v364_v18 }
 0x159   :  { %v424_v7 = vpop.permute.xlu1 %423  ;;  %v396_v21 = vpop.permute.xlu0 %395 }
 0x15a   :  { %v561_v22 = vsel %vm560_vm5, %v548_v9, %v424_v7  ;;  %v552_v23 = vsel %vm547_vm4, %v539_v47, %v396_v21 }
 0x15d   :  { %v326_v31 = vpop.permute.xlu1 %325  ;;  %v294_v33 = vpop.permute.xlu0 %293 }
 0x15e   :  { %v1790_v34 = vsel %vm521_vm2, %v514_v6, %v326_v31  ;;  %v516_v35 = vsel %vm508_vm1, %v503_v32, %v294_v33 }
 0x161   :  { %v354_v19 = vpop.permute.xlu1 %353  ;;  %v336_v24 = vpop.permute.xlu0 %335 }
 0x162   :  { %v1794_v36 = vsel %vm534_vm3, %v523_v13, %v354_v19  ;;  %v1797_v12 = vsel %vm521_vm2, %v519_v16, %v336_v24 }
 0x165   :  { %v368_v25 = vpop.permute.xlu1 %367  ;;  %v358_v37 = vpop.permute.xlu0 %357 }
 0x166   :  { %v1800_v38 = vsel %vm534_vm3, %v530_v5, %v368_v25  ;;  %v1803_v4 = vsel %vm534_vm3, %v525_v17, %v358_v37 }
 0x169   :  { %v428_v27 = vpop.permute.xlu1 %427  ;;  %v400_v39 = vpop.permute.xlu0 %399 }
 0x16a   :  { %v1806_v42 = vsel %vm547_vm4, %v541_v26, %v400_v39  ;;  %v563_v58 = vsel %vm560_vm5, %v550_v20, %v428_v27 }
 0x16d   :  { %v460_v40 = vpop.permute.xlu1 %459  ;;  %v432_v41 = vpop.permute.xlu0 %431 }
 0x16e   :  { %v1822_v51 = vsel %vm573_vm6, %v561_v22, %v460_v40  ;;  %v565_v59 = vsel %vm560_vm5, %v552_v23, %v432_v41 }
 0x16f   :  { %v592_v28 = vrot.slane %v1822_v51, 1  ;;  %v610_v61 = vrot.slane %v1822_v51, 2 }
 0x171   :  { %v330_v43 = vpop.permute.xlu1 %329  ;;  %v298_v45 = vpop.permute.xlu0 %297  ;;  %v604_v55 = vmax.f32 %v1822_v51, %v592_v28 }
 0x172   :  { %v1812_v46 = vsel %vm521_vm2, %v516_v35, %v330_v43  ;;  %v1815_v48 = vsel %vm508_vm1, %v505_v44, %v298_v45 }
 0x173   :  { %v622_v2 = vmax.f32 %v604_v55, %v610_v61 }
 0x175   :  { %v1817_v49 = vpop.permute.xlu1 %371  ;;  %v1819_v50 = vpop.permute.xlu0 %361  ;;  %v710_v5 = vrot.slane %v622_v2, 1  ;;  %v723_v17 = vrot.slane %v622_v2, 3  ;;  %v736_v22 = vrot.slane %v622_v2, 5 }
 0x179   :  { %v1824_v52 = vpop.permute.xlu1 %393  ;;  %v1826_v53 = vpop.permute.xlu0 %389 }
 0x17d   :  { %v436_v29 = vpop.permute.xlu1 %435  ;;  %v1829_v54 = vpop.permute.xlu0 %403 }
 0x17e   :  { %v567_v43 = vsel %vm560_vm5, %v1806_v42, %v436_v29 }
 0x181   :  { %v468_v60 = vpop.permute.xlu1 %467  ;;  %v464_v56 = vpop.permute.xlu0 %463 }
 0x182   :  { %v1836_v62 = vsel %vm573_vm6, %v565_v59, %v468_v60  ;;  %v1839_v47 = vsel %vm573_vm6, %v563_v58, %v464_v56 }
 0x183   :  { %v594_v63 = vrot.slane %v1836_v62, 1  ;;  %v593_v0 = vrot.slane %v1839_v47, 1  ;;  %v612_v6 = vrot.slane %v1836_v62, 2  ;;  %v611_v10 = vrot.slane %v1839_v47, 2 }
 0x185   :  { %v606_v3 = vmax.f32 %v1836_v62, %v594_v63  ;;  %v605_v9 = vmax.f32 %v1839_v47, %v593_v0  ;;  %v1847_v57 = vpop.permute.xlu1 %333  ;;  %v1849_v11 = vpop.permute.xlu0 %301 }
 0x187   :  { %v624_v13 = vmax.f32 %v606_v3, %v612_v6  ;;  %v691_v16 = vrot.slane %v606_v3, 6  ;;  %v623_v15 = vmax.f32 %v605_v9, %v611_v10  ;;  %v688_v1 = vrot.slane %v605_v9, 7 }
 0x189   :  { %v726_v14 = vrot.slane %v624_v13, 1  ;;  %v739_v18 = vrot.slane %v624_v13, 3  ;;  %v690_v20 = vsel %vm689_vm7, %v688_v1, %v604_v55  ;;  %v724_v26 = vrot.slane %v623_v15, 2  ;;  %v1852_v7 = vpop.permute.xlu1 %397  ;;  %v1854_v21 = vpop.permute.xlu0 %365 }
 0x18a   :  { %v737_v23 = vrot.slane %v623_v15, 4  ;;  %v711_v31 = vsel %vm689_vm7, %v623_v15, %v710_v5  ;;  %v712_v33 = vrot.slane %v624_v13, 7  ;;  %v693_v35 = vsel %vm692_vm8, %v691_v16, %v690_v20 }
 0x18b   :  { %v725_v32 = vsel %vm689_vm7, %v724_v26, %v723_v17  ;;  %v551_v13 = vsel %vm547_vm4, %v1803_v4, %v1824_v52  ;;  %v549_v16 = vsel %vm547_vm4, %v1794_v36, %v1826_v53  ;;  %v556_v20 = vsel %vm547_vm4, %v1800_v38, %v1829_v54 }
 0x18c   :  { %v727_v19 = vsel %vm692_vm8, %v726_v14, %v725_v32  ;;  %v738_v24 = vsel %vm689_vm7, %v737_v23, %v736_v22  ;;  %v713_v27 = vsel %vm692_vm8, %v712_v33, %v711_v31  ;;  %v507_v38 = vsel %vm495_vm0, %v1670_v30, %v1677_v8 }
 0x18d   :  { %v426_v25 = vpop.permute.xlu1 %425  ;;  %v1861_v37 = vpop.permute.xlu0 %407  ;;  %v740_v39 = vsel %vm692_vm8, %v739_v18, %v738_v24 }
 0x18e   :  { %v562_v15 = vsel %vm560_vm5, %v549_v16, %v426_v25  ;;  %v542_v16 = vsel %vm534_vm3, %v1812_v46, %v1854_v21 }
 0x191   :  { %v440_v40 = vpop.permute.xlu1 %439  ;;  %v430_v41 = vpop.permute.xlu0 %429 }
 0x192   :  { %v564_v1 = vsel %vm560_vm5, %v551_v13, %v430_v41  ;;  %v569_v52 = vsel %vm560_vm5, %v556_v20, %v440_v40 }
 0x195   :  { %v1867_v44 = vpop.permute.xlu1 %337  ;;  %v472_v45 = vpop.permute.xlu0 %471 }
 0x196   :  { %v1870_v28 = vsel %vm573_vm6, %v567_v43, %v472_v45 }
 0x197   :  { %v595_v55 = vrot.slane %v1870_v28, 1  ;;  %v613_v59 = vrot.slane %v1870_v28, 2 }
 0x199   :  { %v607_v58 = vmax.f32 %v1870_v28, %v595_v55  ;;  %v1875_v60 = vpop.permute.xlu1 %401  ;;  %v1877_v56 = vpop.permute.xlu0 %369 }
 0x19b   :  { %v625_v61 = vmax.f32 %v607_v58, %v613_v59  ;;  %v694_v63 = vrot.slane %v607_v58, 5 }
 0x19d   :  { %v741_v42 = vrot.slane %v625_v61, 2  ;;  %v444_v29 = vpop.permute.xlu1 %443  ;;  %v434_v0 = vpop.permute.xlu0 %433  ;;  %v1880_v2 = vsel %vm695_vm9, %v625_v61, %v727_v19  ;;  %v714_v3 = vrot.slane %v625_v61, 6  ;;  %v1883_v6 = vsel %vm695_vm9, %v694_v63, %v693_v35 }
 0x19e   :  { %v545_v19 = vsel %vm534_vm3, %v1797_v12, %v1817_v49  ;;  %v531_v12 = vsel %vm521_vm2, %v1815_v48, %v1847_v57 }
 0x19f   :  { %v1886_v9 = vsel %vm695_vm9, %v714_v3, %v713_v27  ;;  %v1889_v10 = vsel %vm695_vm9, %v741_v42, %v740_v39 }
 0x1a1   :  { %v466_v5 = vpop.permute.xlu1 %465  ;;  %v462_v17 = vpop.permute.xlu0 %461 }
 0x1a2   :  { %v577_v14 = vsel %vm573_vm6, %v564_v1, %v466_v5  ;;  %v575_v18 = vsel %vm573_vm6, %v562_v15, %v462_v17 }
 0x1a3   :  { %v635_v26 = vrot.slane %v577_v14, 1  ;;  %v634_v4 = vrot.slane %v575_v18, 1  ;;  %v653_v22 = vrot.slane %v577_v14, 2  ;;  %v652_v36 = vrot.slane %v575_v18, 2 }
 0x1a5   :  { %v647_v53 = vmax.f32 %v1839_v47, %v635_v26  ;;  %v671_v23 = vmax.f32 %v577_v14, %v635_v26  ;;  %v646_v31 = vmax.f32 %v1822_v51, %v634_v4  ;;  %v670_v32 = vmax.f32 %v575_v18, %v634_v4  ;;  %v374_v33 = vpop.permute.xlu1 %373  ;;  %v476_v35 = vpop.permute.xlu0 %475 }
 0x1a6   :  { %v1914_v54 = vsel %vm573_vm6, %v569_v52, %v476_v35  ;;  %v540_v51 = vsel %vm534_vm3, %v1790_v34, %v1819_v50  ;;  %v520_v34 = vsel %vm508_vm1, %v507_v38, %v1849_v11  ;;  %v558_v50 = vsel %vm547_vm4, %v545_v19, %v1861_v37 }
 0x1a7   :  { %v665_v24 = vmax.f32 %v647_v53, %v653_v22  ;;  %v677_v47 = vmax.f32 %v671_v23, %v653_v22  ;;  %v664_v25 = vmax.f32 %v646_v31, %v652_v36  ;;  %v676_v27 = vmax.f32 %v670_v32, %v652_v36 }
 0x1a8   :  { %v596_v49 = vrot.slane %v1914_v54, 1  ;;  %v614_v30 = vrot.slane %v1914_v54, 2  ;;  %v553_v48 = vsel %vm547_vm4, %v540_v51, %v1852_v7  ;;  %v571_v11 = vsel %vm560_vm5, %v558_v50, %v444_v29 }
 0x1a9   :  { %v756_v8 = vrot.slane %v665_v24, 6  ;;  %v789_v39 = vrot.slane %v677_v47, 2  ;;  %v802_v40 = vrot.slane %v677_v47, 4  ;;  %v755_v41 = vrot.slane %v664_v25, 7  ;;  %v438_v43 = vpop.permute.xlu1 %437  ;;  %v406_v45 = vpop.permute.xlu0 %405 }
 0x1aa   :  { %v775_v55 = vrot.slane %v676_v27, 1  ;;  %v788_v58 = vrot.slane %v676_v27, 3  ;;  %v801_v59 = vrot.slane %v676_v27, 5  ;;  %v608_v61 = vmax.f32 %v1914_v54, %v596_v49 }
 0x1ab   :  { %v757_v57 = vsel %vm689_vm7, %v756_v8, %v755_v41  ;;  %v566_v15 = vsel %vm560_vm5, %v553_v48, %v434_v0  ;;  %v533_v20 = vsel %vm521_vm2, %v520_v34, %v1867_v44  ;;  %v555_v32 = vsel %vm547_vm4, %v542_v16, %v1875_v60 }
 0x1ac   :  { %v626_v63 = vmax.f32 %v608_v61, %v614_v30  ;;  %v697_v42 = vrot.slane %v608_v61, 4  ;;  %v776_v3 = vsel %vm689_vm7, %v677_v47, %v775_v55  ;;  %v803_v13 = vsel %vm689_vm7, %v802_v40, %v801_v59 }
 0x1ad   :  { %v480_v7 = vpop.permute.xlu1 %479  ;;  %v470_v1 = vpop.permute.xlu0 %469  ;;  %v790_v37 = vsel %vm689_vm7, %v789_v39, %v788_v58  ;;  %v568_v24 = vsel %vm560_vm5, %v555_v32, %v438_v43  ;;  %vm1121_vm7 = vcmask 25600  }
 0x1ae   :  { %v1941_v5 = vsel %vm573_vm6, %v571_v11, %v480_v7  ;;  %v579_v17 = vsel %vm573_vm6, %v566_v15, %v470_v1  ;;  %v729_v14 = vrot.slane %v626_v63, 7  ;;  %v716_v18 = vrot.slane %v626_v63, 5 }
 0x1af   :  { %v597_v46 = vrot.slane %v1941_v5, 1  ;;  %v615_v21 = vrot.slane %v1941_v5, 2  ;;  %v636_v29 = vrot.slane %v579_v17, 1  ;;  %v743_v4 = vrot.slane %v626_v63, 1 }
 0x1b0   :  { %v730_v0 = vsel %vm698_vm10, %v729_v14, %v1880_v2  ;;  %v717_v26 = vsel %vm698_vm10, %v716_v18, %v1886_v9  ;;  %v699_v52 = vsel %vm698_vm10, %v697_v42, %v1883_v6  ;;  %v654_v44 = vrot.slane %v579_v17, 2 }
 0x1b1   :  { %v609_v22 = vmax.f32 %v1941_v5, %v597_v46  ;;  %v648_v36 = vmax.f32 %v1836_v62, %v636_v29  ;;  %v672_v53 = vmax.f32 %v579_v17, %v636_v29  ;;  %v442_v23 = vpop.permute.xlu1 %441  ;;  %v410_v31 = vpop.permute.xlu0 %409  ;;  %v544_v2 = vsel %vm534_vm3, %v531_v12, %v1877_v56 }
 0x1b2   :  { %v546_v9 = vsel %vm534_vm3, %v533_v20, %v374_v33  ;;  %v744_v35 = vsel %vm698_vm10, %v743_v4, %v1889_v10  ;;  %v557_v6 = vsel %vm547_vm4, %v544_v2, %v406_v45  ;;  %vm822_vm3 = vcmask 326656  }
 0x1b3   :  { %v627_v19 = vmax.f32 %v609_v22, %v615_v21  ;;  %v666_v38 = vmax.f32 %v648_v36, %v654_v44  ;;  %v678_v62 = vmax.f32 %v672_v53, %v654_v44  ;;  %v570_v47 = vsel %vm560_vm5, %v557_v6, %v442_v23 }
 0x1b4   :  { %v559_v25 = vsel %vm547_vm4, %v546_v9, %v410_v31  ;;  %v700_v49 = vrot.slane %v609_v22, 3  ;;  %vm824_vm4 = vcmask 392192  }
 0x1b5   :  { %v758_v60 = vrot.slane %v666_v38, 5  ;;  %v777_v27 = vrot.slane %v678_v62, 7  ;;  %v791_v56 = vrot.slane %v678_v62, 1  ;;  %v804_v51 = vrot.slane %v678_v62, 3  ;;  %v446_v33 = vpop.permute.xlu1 %445  ;;  %v474_v12 = vpop.permute.xlu0 %473 }
 0x1b6   :  { %v581_v10 = vsel %vm573_vm6, %v568_v24, %v474_v12  ;;  %v731_v30 = vrot.slane %v627_v19, 6  ;;  %v718_v8 = vrot.slane %v627_v19, 4  ;;  %v572_v39 = vsel %vm560_vm5, %v559_v25, %v446_v33 }
 0x1b7   :  { %v637_v40 = vrot.slane %v581_v10, 1  ;;  %v745_v41 = vsel %vm701_vm11, %v627_v19, %v744_v35  ;;  %v778_v43 = vsel %vm692_vm8, %v777_v27, %v776_v3  ;;  %v759_v58 = vsel %vm692_vm8, %v758_v60, %v757_v57 }
 0x1b8   :  { %v732_v45 = vsel %vm701_vm11, %v731_v30, %v730_v0  ;;  %v719_v55 = vsel %vm701_vm11, %v718_v8, %v717_v26  ;;  %v805_v59 = vsel %vm692_vm8, %v804_v51, %v803_v13  ;;  %v655_v34 = vrot.slane %v581_v10, 2 }
 0x1b9   :  { %v649_v61 = vmax.f32 %v1870_v28, %v637_v40  ;;  %v673_v48 = vmax.f32 %v581_v10, %v637_v40  ;;  %733 = vrot.lane.b32.xlu1 %v732_v45, %s1303_s16  ;;  %720 = vrot.lane.b32.xlu0 %v719_v55, %s1296_s24  ;;  %v482_v50 = vpop.permute.xlu1 %481  ;;  %v478_v63 = vpop.permute.xlu0 %477  ;;  %v792_v42 = vsel %vm692_vm8, %v791_v56, %v790_v37  ;;  %s2001_s24 = sld [smem:[#allocation2 + $0x11]]  ;;  %vm826_vm5 = vcmask 457728   ;;  %s2075_s16 = sld [smem:[#allocation2 + $0x24]] }
 0x1ba   :  { %v585_v3 = vsel %vm573_vm6, %v572_v39, %v482_v50  ;;  %v583_v16 = vsel %vm573_vm6, %v570_v47, %v478_v63  ;;  %v702_v57 = vsel %vm701_vm11, %v700_v49, %v699_v52  ;;  %v832_v40 = vstv %s1995_s21  ;;  %s2090_s21 = sld [smem:[#allocation2 + $0x2b]] }
 0x1bb   :  { %v667_v11 = vmax.f32 %v649_v61, %v655_v34  ;;  %v679_v13 = vmax.f32 %v673_v48, %v655_v34  ;;  %v639_v15 = vrot.slane %v585_v3, 1  ;;  %v657_v28 = vrot.slane %v585_v3, 2 }
 0x1bc   :  { %v638_v7 = vrot.slane %v583_v16, 1  ;;  %v656_v1 = vrot.slane %v583_v16, 2  ;;  %v852_v45 = vstv %s1999_s23  ;;  %v829_v61 = vstv %s2005_s26  ;;  %s2094_s23 = sld [smem:[#allocation2 + $0x2c]]  ;;  %s2104_s26 = sld [smem:[#allocation2 + $0x2f]] }
 0x1bd   :  { %v760_v17 = vrot.slane %v667_v11, 4  ;;  %v779_v14 = vrot.slane %v679_v13, 6  ;;  %v806_v18 = vrot.slane %v679_v13, 2  ;;  %v651_v20 = vmax.f32 %v1941_v5, %v639_v15  ;;  %746 = vrot.lane.b32.xlu0 %v745_v41, %s1304_s17  ;;  %s2077_s17 = sld [smem:[#allocation2 + $0x25]] }
 0x1be   :  { %v675_v37 = vmax.f32 %v585_v3, %v639_v15  ;;  %v650_v46 = vmax.f32 %v1914_v54, %v638_v7  ;;  %v674_v21 = vmax.f32 %v583_v16, %v638_v7  ;;  %v793_v29 = vsel %vm695_vm9, %v679_v13, %v792_v42 }
 0x1bf   :  { %v669_v0 = vmax.f32 %v651_v20, %v657_v28  ;;  %v780_v26 = vsel %vm695_vm9, %v779_v14, %v778_v43  ;;  %v761_v4 = vsel %vm695_vm9, %v760_v17, %v759_v58  ;;  %v807_v52 = vsel %vm695_vm9, %v806_v18, %v805_v59 }
 0x1c0   :  { %v681_v22 = vmax.f32 %v675_v37, %v657_v28  ;;  %v668_v36 = vmax.f32 %v650_v46, %v656_v1  ;;  %v680_v44 = vmax.f32 %v674_v21, %v656_v1  ;;  %v839_v41 = vstv %s1997_s22  ;;  %s2092_s22 = sld [smem:[#allocation2 + $0x29]] }
 0x1c1   :  { %v764_v53 = vrot.slane %v669_v0, 2  ;;  %v859_v55 = vstv %s2001_s24  ;;  %v872_v58 = vstv %s2003_s25  ;;  %v879_v34 = vstv %s2007_s27  ;;  %s2099_s24 = sld [smem:[#allocation2 + $0x2d]]  ;;  %s2101_s25 = sld [smem:[#allocation2 + $0x2e]] }
 0x1c2   :  { %v762_v5 = vrot.slane %v668_v36, 3  ;;  %v781_v23 = vrot.slane %v680_v44, 5  ;;  %v783_v31 = vrot.slane %v681_v22, 4  ;;  %v808_v32 = vrot.slane %v680_v44, 1  ;;  %s2120_s27 = sld [smem:[#allocation2 + $0x33]] }
 0x1c3   :  { %v794_v2 = vrot.slane %v680_v44, 7  ;;  %v796_v54 = vrot.slane %v681_v22, 6  ;;  %v849_v63 = vstv %s2009_s28  ;;  %v869_v42 = vstv %s2011_s29  ;;  %s2126_s28 = sld [smem:[#allocation2 + $0x34]]  ;;  %s2128_s29 = sld [smem:[#allocation2 + $0x35]] }
 0x1c4   :  { %v782_v9 = vsel %vm698_vm10, %v781_v23, %v780_v26  ;;  %v763_v35 = vsel %vm698_vm10, %v762_v5, %v761_v4  ;;  %v809_v6 = vsel %vm698_vm10, %v808_v32, %v807_v52  ;;  %v846_v20 = vstv %s2013_s30  ;;  %s2132_s30 = sld [smem:[#allocation2 + $0x30]] }
 0x1c5   :  { %v784_v19 = vsel %vm701_vm11, %v783_v31, %v782_v9  ;;  %v765_v38 = vsel %vm701_vm11, %v764_v53, %v763_v35  ;;  %v810_v62 = vsel %vm701_vm11, %v681_v22, %v809_v6  ;;  %v795_v24 = vsel %vm698_vm10, %v794_v2, %v793_v29 }
 0x1c6   :  { %785 = vrot.lane.b32.xlu0 %v784_v19, %s1305_s18  ;;  %766 = vrot.lane.b32.xlu1 %v765_v38, %s1306_s19  ;;  %v797_v47 = vsel %vm701_vm11, %v796_v54, %v795_v24  ;;  %v866_v26 = vstv %s2019_s3  ;;  %v886_v4 = vstv %s2022_s4  ;;  %s2079_s18 = sld [smem:[#allocation2 + $0x26]]  ;;  %s2083_s19 = sld [smem:[#allocation2 + $0x27]]  ;;  %vm1049_vm6 = vcmask 517120  }
 0x1c7   :  { %v895_v23 = vstv %s2037_s5  ;;  %v909_v2 = vstv %s2041_s6  ;;  %v923_v54 = vstv %s2043_s1  ;;  %v898_v35 = vstv %s2046_s7  ;;  %s2134_s3 = sld [smem:[#allocation2 + $0x31]]  ;;  %s2138_s4 = sld [smem:[#allocation2 + $0x36]] }
 0x1c8   :  { %v912_v6 = vstv %s2048_s8  ;;  %v926_v24 = vstv %s2052_s10  ;;  %s2140_s5 = sld [smem:[#allocation2 + $0x37]]  ;;  %s2145_s6 = sld [smem:[#allocation2 + $0x32]] }
 0x1c9   :  { %s2147_s1 = sld [smem:[#allocation2 + $0x38]]  ;;  %s2150_s7 = sld [smem:[#allocation2 + $0x3a]] }
 0x1ca   :  { %811 = vrot.lane.b32.xlu0 %v810_v62, %s1307_s20  ;;  %798 = vrot.lane.b32.xlu1 %v797_v47, %s1308_s0  ;;  %v902_v62 = vstv %s2050_s9  ;;  %s2085_s20 = sld [smem:[#allocation2 + $0x28]]  ;;  %s2088_s0 = sld [smem:[#allocation2 + $0x2a]] }
 0x1cb   :  { %s2152_s8 = sld [smem:[#allocation2 + $0x39]]  ;;  %s2155_s9 = sld [smem:[#allocation2 + $0x3b]] }
 0x1cc   :  { %s2171_s10 = sld [smem:[#allocation2 + $0x3d]] }
 0x22b   :  { %v721_v25 = vpop.permute.xlu0 %720  ;;  %v734_v60 = vpop.permute.xlu1 %733 }
 0x22c   :  { %v815_v27 = vsel %vm814_vm12, %v702_v57, %v721_v25 }
 0x22d   :  { %v817_v51 = vsel %vm816_vm13, %v815_v27, %v734_v60  ;;  %v916_v60 = vstv %s2056_s11  ;;  %s2173_s11 = sld [smem:[#allocation2 + $0x40]] }
 0x22f   :  { %v747_v56 = vpop.permute.xlu0 %746 }
 0x230   :  { %v819_v33 = vsel %vm818_vm14, %v817_v51, %v747_v56 }
 0x238   :  { %v767_v12 = vpop.permute.xlu1 %766  ;;  %v786_v49 = vpop.permute.xlu0 %785 }
 0x239   :  { %v821_v10 = vsel %vm820_vm15, %v819_v33, %v767_v12  ;;  %v930_v33 = vstv %s2058_s12  ;;  %s2175_s12 = sld [smem:[#allocation2 + $0x43]] }
 0x23a   :  { %v823_v30 = vsel %vm822_vm3, %v821_v10, %v786_v49 }
 0x23c   :  { %v799_v8 = vpop.permute.xlu1 %798  ;;  %v812_v39 = vpop.permute.xlu0 %811 }
 0x23d   :  { %v825_v43 = vsel %vm824_vm4, %v823_v30, %v799_v8 }
 0x23e   :  { %v2024_v59 = vsel %vm826_vm5, %v825_v43, %v812_v39  ;;  %v906_v39 = vstv %s2061_s13  ;;  %s2177_s13 = sld [smem:[#allocation2 + $0x46]] }
 0x23f   :  { %v833_v48 = vmul.f32 %v832_v40, %v2024_v59  ;;  %v840_v50 = vmul.f32 %v839_v41, %v2024_v59  ;;  %v853_v3 = vmul.f32 %v852_v45, %v2024_v59  ;;  %v860_v16 = vmul.f32 %v859_v55, %v2024_v59 }
 0x240   :  { %v873_v57 = vmul.f32 %v872_v58, %v2024_v59  ;;  %v830_v11 = vmul.f32 %v829_v61, %v2024_v59  ;;  %v880_v15 = vmul.f32 %v879_v34, %v2024_v59  ;;  %v850_v28 = vmul.f32 %v849_v63, %v2024_v59 }
 0x241   :  { %v835_v13 = vrot.slane %v833_v48, 2  ;;  %v855_v7 = vrot.slane %v853_v3, 2  ;;  %v870_v1 = vmul.f32 %v869_v42, %v2024_v59  ;;  %v842_v18 = vrot.slane %v840_v50, 4 }
 0x242   :  { %v875_v17 = vrot.slane %v873_v57, 2  ;;  %v862_v46 = vrot.slane %v860_v16, 4  ;;  %v882_v29 = vrot.slane %v880_v15, 4  ;;  %v920_v40 = vstv %s2063_s14  ;;  %s2179_s14 = sld [smem:[#allocation2 + $0x3c]] }
 0x243   :  { %v837_v14 = vadd.f32 %v835_v13, %v830_v11  ;;  %v857_v37 = vadd.f32 %v855_v7, %v850_v28  ;;  %v934_v58 = vstv %s2067_s15  ;;  %v940_v50 = vrot.slane %v2024_v59, 2  ;;  %s2181_s15 = sld [smem:[#allocation2 + $0x3f]] }
 0x244   :  { %v877_v21 = vadd.f32 %v875_v17, %v870_v1  ;;  %v945_v42 = vrot.slane %v2024_v59, 4  ;;  %v951_v15 = vstv %s2075_s16  ;;  %v954_v7 = vstv %s2077_s17  ;;  %s2183_s16 = sld [smem:[#allocation2 + $0x42]]  ;;  %s2185_s17 = sld [smem:[#allocation2 + $0x45]] }
 0x245   :  { %v844_v0 = vadd.f32 %v842_v18, %v837_v14  ;;  %v864_v52 = vadd.f32 %v862_v46, %v857_v37  ;;  %v965_v1 = vstv %s2083_s19  ;;  %v968_v17 = vstv %s2085_s20  ;;  %s2189_s19 = sld [smem:[#allocation2 + $0x41]]  ;;  %s2191_s20 = sld [smem:[#allocation2 + $0x44]] }
 0x246   :  { %v884_v22 = vadd.f32 %v882_v29, %v877_v21  ;;  %v979_v18 = vstv %s2088_s0  ;;  %v958_v46 = vstv %s2079_s18  ;;  %v972_v21 = vstv %s2092_s22  ;;  %s2187_s18 = sld [smem:[#allocation2 + $0x3e]]  ;;  %s2193_s0 = sld [smem:[#allocation2 + $0x47]] }
 0x247   :  { %v847_v36 = vadd.f32 %v846_v20, %v844_v0  ;;  %v867_v44 = vadd.f32 %v866_v26, %v864_v52  ;;  %v982_v20 = vstv %s2090_s21  ;;  %v986_v29 = vstv %s2094_s23  ;;  %s2197_s21 = sld [smem:[#allocation2 + $0x48]]  ;;  %s2203_s22 = sld [smem:[#allocation2 + $0x49]] }
 0x248   :  { %v887_v53 = vadd.f32 %v886_v4, %v884_v22  ;;  %s2205_s23 = sld [smem:[#allocation2 + $0x4a]] }
 0x249   :  { %v888_v5 = vmax.f32 %v847_v36, 0.0  ;;  %v890_v31 = vmax.f32 %v867_v44, 0.0 }
 0x24a   :  { %v892_v32 = vmax.f32 %v887_v53, 0.0 }
 0x24b   :  { %v889_v9 = vmin.f32 %v888_v5, 6.0  ;;  %v891_v19 = vmin.f32 %v890_v31, 6.0  ;;  %v962_v31 = vstv %s2099_s24  ;;  %s2213_s24 = sld [smem:[#allocation2 + $0x4b]] }
 0x24c   :  { %v893_v38 = vmin.f32 %v892_v32, 6.0  ;;  %v976_v32 = vstv %s2101_s25  ;;  %s1309_s25 = smov [#allocation7]  }
 0x24d   :  { %v896_v47 = vmul.f32 %v895_v23, %v889_v9  ;;  %v910_v25 = vmul.f32 %v909_v2, %v889_v9  ;;  %v924_v27 = vmul.f32 %v923_v54, %v889_v9  ;;  %v899_v56 = vmul.f32 %v898_v35, %v891_v19 }
 0x24e   :  { %v913_v51 = vmul.f32 %v912_v6, %v891_v19  ;;  %v927_v12 = vmul.f32 %v926_v24, %v891_v19  ;;  %v903_v10 = vmul.f32 %v902_v62, %v893_v38  ;;  %v917_v8 = vmul.f32 %v916_v60, %v893_v38 }
 0x24f   :  { %v900_v49 = vadd.f32 %v899_v56, %v896_v47  ;;  %v931_v43 = vmul.f32 %v930_v33, %v893_v38  ;;  %v990_v6 = vstv %s2104_s26  ;;  %v1013_v60 = vstv %s2120_s27  ;;  %s1129_s26 = sshll.u32 %s1309_s25, 4  ;;  %s1130_s26 = int_to_ptr.vmem [resolvable:$true] %s1129_s26 }
 0x250   :  { %v914_v30 = vadd.f32 %v913_v51, %v910_v25  ;;  %v928_v41 = vadd.f32 %v927_v12, %v924_v27  ;;  %v1016_v56 = vstv %s2126_s28  ;;  %v999_v51 = vstv %s2132_s30  ;;  %s1265_s27 = scalar_lea.vmem %s1130_s26, 32  ;;  %p1270_p0 = scmp.lt.s32.totalorder %s1130_s26, %s1130_s26 }
 0x251   :  { %v904_v45 = vadd.f32 %v903_v10, %v900_v49  ;;  %v1002_v33 = vstv %s2134_s3  ;;  %v1027_v10 = vstv %s2138_s4  ;;  %p1266_p13 = scmp.ne.s32.totalorder %s1130_s26, %s1265_s27  ;;  %p1271_p1 = scmp.lt.s32.totalorder %s1265_s27, %s1265_s27 }
 0x252   :  { %v918_v55 = vadd.f32 %v917_v8, %v914_v30  ;;  %v932_v61 = vadd.f32 %v931_v43, %v928_v41  ;;  %v1030_v30 = vstv %s2140_s5  ;;  %v1034_v41 = vstv %s2147_s1 }
 0x253   :  { %v907_v34 = vadd.f32 %v906_v39, %v904_v45  ;;  %v1020_v39 = vstv %s2128_s29  ;;  %p1272_p2 = por %p1271_p1, %p1270_p0 }
 0x254   :  { %v921_v48 = vadd.f32 %v920_v40, %v918_v55  ;;  %v935_v63 = vadd.f32 %v934_v58, %v932_v61  ;;  %v1006_v40 = vstv %s2145_s6 }
 0x255   :  { %v936_v3 = vadd.f32 %v907_v34, %v2024_v59  ;;  %p1273_p3 = pnand %p1272_p2, %p1266_p13 }
 0x256   :  { %v942_v16 = vadd.f32 %v940_v50, %v921_v48  ;;  %v947_v57 = vadd.f32 %v945_v42, %v935_v63 }
 0x257   :  { %v937_v11 = vmax.f32 %v936_v3, 0.0  ;;  %v1024_v3 = vstv %s2150_s7 }
 0x258   :  { %v943_v13 = vmax.f32 %v942_v16, 0.0  ;;  %v948_v28 = vmax.f32 %v947_v57, 0.0  ;;  %v1010_v16 = vstv %s2152_s8 }
 0x259   :  { %v2109_v59 = vmin.f32 %v937_v11, 6.0 }
 0x25a   :  { %v2111_v14 = vmin.f32 %v943_v13, 6.0  ;;  %v2115_v37 = vmin.f32 %v948_v28, 6.0  ;;  %v1038_v28 = vstv %s2155_s9 }
 0x25b   :  { %v952_v0 = vmul.f32 %v951_v15, %v2109_v59  ;;  %v966_v4 = vmul.f32 %v965_v1, %v2109_v59  ;;  %v980_v22 = vmul.f32 %v979_v18, %v2109_v59 }
 0x25c   :  { %v955_v26 = vmul.f32 %v954_v7, %v2111_v14  ;;  %v969_v52 = vmul.f32 %v968_v17, %v2111_v14  ;;  %v983_v36 = vmul.f32 %v982_v20, %v2111_v14  ;;  %v959_v53 = vmul.f32 %v958_v46, %v2115_v37 }
 0x25d   :  { %v973_v23 = vmul.f32 %v972_v21, %v2115_v37  ;;  %v987_v54 = vmul.f32 %v986_v29, %v2115_v37 }
 0x25e   :  { %v956_v44 = vadd.f32 %v955_v26, %v952_v0  ;;  %v970_v5 = vadd.f32 %v969_v52, %v966_v4  ;;  %v984_v2 = vadd.f32 %v983_v36, %v980_v22 }
 0x260   :  { %v960_v9 = vadd.f32 %v959_v53, %v956_v44  ;;  %v974_v35 = vadd.f32 %v973_v23, %v970_v5  ;;  %v988_v19 = vadd.f32 %v987_v54, %v984_v2  ;;  %v1108_v5 = vstv %s2177_s13 }
 0x262   :  { %v963_v38 = vadd.f32 %v962_v31, %v960_v9  ;;  %v977_v62 = vadd.f32 %v976_v32, %v974_v35  ;;  %v991_v24 = vadd.f32 %v990_v6, %v988_v19  ;;  %v1063_v31 = vstv %s2179_s14 }
 0x263   :  { %v1077_v32 = vstv %s2181_s15  ;;  %v1091_v9 = vstv %s2183_s16  ;;  %v1105_v35 = vstv %s2185_s17  ;;  %v1070_v19 = vstv %s2187_s18 }
 0x264   :  { %v992_v47 = vmax.f32 %v963_v38, 0.0  ;;  %v994_v25 = vmax.f32 %v977_v62, 0.0  ;;  %v996_v27 = vmax.f32 %v991_v24, 0.0  ;;  %v1084_v38 = vstv %s2189_s19 }
 0x265   :  { %v1098_v62 = vstv %s2191_s20  ;;  %v1112_v24 = vstv %s2193_s0 }
 0x266   :  { %v993_v12 = vmin.f32 %v992_v47, 6.0  ;;  %v995_v49 = vmin.f32 %v994_v25, 6.0  ;;  %v997_v8 = vmin.f32 %v996_v27, 6.0 }
 0x268   :  { %v1014_v43 = vmul.f32 %v1013_v60, %v993_v12  ;;  %v1017_v45 = vmul.f32 %v1016_v56, %v995_v49  ;;  %v1000_v55 = vmul.f32 %v999_v51, %v993_v12  ;;  %v1003_v58 = vmul.f32 %v1002_v33, %v995_v49 }
 0x269   :  { %v1028_v61 = vmul.f32 %v1027_v10, %v993_v12  ;;  %v1031_v34 = vmul.f32 %v1030_v30, %v995_v49  ;;  %v1021_v50 = vmul.f32 %v1020_v39, %v997_v8  ;;  %v1007_v42 = vmul.f32 %v1006_v40, %v997_v8 }
 0x26a   :  { %v1018_v48 = vadd.f32 %v1017_v45, %v1014_v43  ;;  %v1004_v63 = vadd.f32 %v1003_v58, %v1000_v55  ;;  %v1035_v11 = vmul.f32 %v1034_v41, %v997_v8  ;;  %v1074_v58 = vstv %s2197_s21 }
 0x26b   :  { %v1032_v57 = vadd.f32 %v1031_v34, %v1028_v61  ;;  %v1088_v61 = vstv %s2203_s22  ;;  %v1102_v34 = vstv %s2205_s23 }
 0x26c   :  { %v1022_v13 = vadd.f32 %v1021_v50, %v1018_v48  ;;  %v1008_v15 = vadd.f32 %v1007_v42, %v1004_v63 }
 0x26d   :  { %v1036_v7 = vadd.f32 %v1035_v11, %v1032_v57 }
 0x26e   :  { %v1025_v1 = vadd.f32 %v1024_v3, %v1022_v13  ;;  %v1011_v17 = vadd.f32 %v1010_v16, %v1008_v15  ;;  %v1116_v3 = vstv %s2213_s24 }
 0x26f   :  { %v1039_v18 = vadd.f32 %v1038_v28, %v1036_v7 }
 0x270   :  { %v1043_v20 = vadd.f32 %v1025_v1, %v2111_v14  ;;  %v1040_v46 = vadd.f32 %v1011_v17, %v2109_v59  ;;  %v1066_v59 = vstv %s2171_s10  ;;  %v1080_v14 = vstv %s2173_s11 }
 0x271   :  { %v1046_v21 = vadd.f32 %v1039_v18, %v2115_v37  ;;  %v1094_v37 = vstv %s2175_s12 }
 0x272   :  { %v1044_v29 = vmax.f32 %v1043_v20, 0.0  ;;  %v1041_v0 = vmax.f32 %v1040_v46, 0.0 }
 0x273   :  { %v1047_v26 = vmax.f32 %v1046_v21, 0.0 }
 0x274   :  { %v1045_v4 = vmin.f32 %v1044_v29, 6.0  ;;  %v1042_v52 = vmin.f32 %v1041_v0, 6.0 }
 0x275   :  { %v1048_v44 = vmin.f32 %v1047_v26, 6.0 }
 0x276   :  { %v1054_v22 = vsel %vm1049_vm6, %v1045_v4, 0.0  ;;  %v1050_v36 = vsel %vm1049_vm6, %v1042_v52, 0.0 }
 0x277   :  { %1055 = vadd.xlane.f32.xlu0 %v1054_v22  ;;  %1051 = vadd.xlane.f32.xlu1 %v1050_v36  ;;  %v1058_v53 = vsel %vm1049_vm6, %v1048_v44, 0.0 }
 0x27b   :  { %1059 = vadd.xlane.f32.xlu0 %v1058_v53 }
 0x304   :  { %v1056_v23 = vpop.xlane.xlu0 %1055  ;;  %v1052_v2 = vpop.xlane.xlu1 %1051 }
 0x305   :  { %v1057_v54 = vmul.f32 0.015625, %v1056_v23  ;;  %v1053_v6 = vmul.f32 0.015625, %v1052_v2 }
 0x307   :  { %v1067_v47 = vmul.f32 %v1066_v59, %v1057_v54  ;;  %v1081_v25 = vmul.f32 %v1080_v14, %v1057_v54  ;;  %v1095_v60 = vmul.f32 %v1094_v37, %v1057_v54  ;;  %v1109_v27 = vmul.f32 %v1108_v5, %v1057_v54 }
 0x308   :  { %v1064_v56 = vmul.f32 %v1063_v31, %v1053_v6  ;;  %v1078_v51 = vmul.f32 %v1077_v32, %v1053_v6  ;;  %v1092_v33 = vmul.f32 %v1091_v9, %v1053_v6  ;;  %v1106_v12 = vmul.f32 %v1105_v35, %v1053_v6  ;;  %v1060_v49 = vpop.xlane.xlu0 %1059 }
 0x309   :  { %v1061_v10 = vmul.f32 0.015625, %v1060_v49 }
 0x30a   :  { %v1068_v30 = vadd.f32 %v1067_v47, %v1064_v56  ;;  %v1082_v8 = vadd.f32 %v1081_v25, %v1078_v51  ;;  %v1096_v39 = vadd.f32 %v1095_v60, %v1092_v33  ;;  %v1110_v40 = vadd.f32 %v1109_v27, %v1106_v12 }
 0x30b   :  { %v1071_v41 = vmul.f32 %v1070_v19, %v1061_v10  ;;  %v1085_v43 = vmul.f32 %v1084_v38, %v1061_v10  ;;  %v1099_v45 = vmul.f32 %v1098_v62, %v1061_v10  ;;  %v1113_v55 = vmul.f32 %v1112_v24, %v1061_v10 }
 0x30d   :  { %v1072_v48 = vadd.f32 %v1071_v41, %v1068_v30  ;;  %v1086_v50 = vadd.f32 %v1085_v43, %v1082_v8  ;;  %v1100_v63 = vadd.f32 %v1099_v45, %v1096_v39  ;;  %v1114_v42 = vadd.f32 %v1113_v55, %v1110_v40 }
 0x30f   :  { %v1075_v16 = vadd.f32 %v1074_v58, %v1072_v48  ;;  %v1089_v57 = vadd.f32 %v1088_v61, %v1086_v50  ;;  %v1103_v11 = vadd.f32 %v1102_v34, %v1100_v63  ;;  %v1117_v13 = vadd.f32 %v1116_v3, %v1114_v42 }
 0x311   :  { %v1118_v15 = vsel %vm495_vm0, %v1075_v16, %v1089_v57 }
 0x312   :  { %v1119_v28 = vsel %vm508_vm1, %v1118_v15, %v1103_v11 }
 0x313   :  { %v1120_v7 = vsel %vm521_vm2, %v1119_v28, %v1117_v13 }
 0x314   :  { %1122 = vst.msk [vmem:[#allocation7] sm:$0x3] %vm1121_vm7, %v1120_v7 }
 0x315   :  { %1276 = shalt.err (!%p1273_p3)
}
 0x316   :  { %s1277_s30 = scalar_lea.hbm %s2236_s2, 32 }
 0x317   :  { %p1278_p4 = scmp.ne.s32.totalorder %s2236_s2, %s1277_s30  ;;  %p1281_p5 = scmp.lt.u32.totalorder %s1277_s30, %s2236_s2 }
 0x319   :  { %p1283_p6 = pnand %p1281_p5, %p1278_p4 }
 0x31b   :  { %1286 = shalt.err (!%p1283_p6)
}
 0x31c   :  { %1132 = dma.vmem_to_hbm [thread:$0]  %s1130_s26, 32, %s2236_s2, [#allocation4]  }
 0x31d   :  { %1291 = dma.done.wait [#allocation4], 32  }
 0x31e   :  { %1292 = vsyncadd [#allocation4], 4294967264 }
 0x31f   :  { %1136 = vsyncpa [#allocation3], 1 }
 0x320   :  { %1137 = vsyncpa [#allocation4], 1 }
 0x321   :  { %1138 = vsyncpa [#allocation5], 1 }

</bundles_post_ra>
